<compile_context>
chip_gen: v6e
topology: v6e:2x2x1
jax: 0.10.0
libtpu: 0.0.40
codegen_flags: <defaults>
</compile_context>

<pallas_src>
import numpy as np
import jax
import jax.numpy as jnp
from jax.experimental import pallas as pl
from jax.experimental.pallas import tpu as pltpu


# ----------------- fused CNN + LSTM + Linear kernel -----------------

def _make_fused_kernel(dims, conv_cfg):
    T, B, G, C1, C2, H, O = dims
    K2, s2, pk1, ps1, pk2, ps2 = conv_cfg
    N = T * B
    GC1, GC2, H4 = G * C1, G * C2, 4 * H

    def maxpool_lead(h, out_len, ks, st):
        # Max-pool along the leading (position) axis. Fast path (ks == st):
        # leading reshape + vectorized maximum fold over the window axis.
        if ks == st and h.shape[0] >= out_len * ks:
            hr = h[:out_len * ks].reshape(out_len, ks, *h.shape[1:])
            r = hr[:, 0]
            for j in range(1, ks):
                r = jnp.maximum(r, hr[:, j])
            return r
        rows = []                                 # general (ks != st) fallback
        for p in range(out_len):
            m = h[p * st]
            for j in range(1, ks):
                m = jnp.maximum(m, h[p * st + j])
            rows.append(m)
        return jnp.stack(rows, axis=0)

    def tap(src, k, out_len, stride):
        # positions p*stride + k along the leading axis
        if stride == 1:
            return src[k:k + out_len]
        return jnp.stack([src[p * stride + k] for p in range(out_len)], axis=0)

    def sigmoid_eup(z):
        # exp + approximate reciprocal -> both on the EUP slot (no VPU divide).
        return pl.reciprocal(1.0 + jnp.exp(-z), approx=True)

    def kernel(slab1_ref, w1_ref, w2_ref, wih_ref, whh_ref, misc_ref, out_ref):
        # misc packing: row0 = conv1 bias (GC1 lanes), row1 = conv2 bias (GC2 lanes),
        # row2 = LSTM bias (4H lanes, gate order i,f,o,g), rows 3:3+H = Wlin^T
        # (zero-padded to 128 lanes), row 3+H = linear bias.
        b1 = misc_ref[0:1, 0:GC1]
        b2 = misc_ref[1:2, 0:GC2]
        blstm = misc_ref[2:3, 0:H4]
        wlinT = misc_ref[3:3 + H, :]
        blin = misc_ref[3 + H:4 + H, :]

        # ---- conv1: single matmul on the pre-unfolded (L1*N, K1*G) slab ----
        slab1 = slab1_ref[...]
        L1 = slab1.shape[0] // N
        h1 = (jnp.dot(slab1, w1_ref[...], preferred_element_type=jnp.float32)
              + b1).reshape(L1, N, GC1)

        # ---- maxpool1 over positions (leading axis) ----
        Lp1 = (L1 - pk1) // ps1 + 1
        p1 = maxpool_lead(h1, Lp1, pk1, ps1)                     # (Lp1, N, GC1)

        # ---- conv2: unfold K2 taps along lanes, single matmul ----
        L2 = (Lp1 - K2) // s2 + 1
        slab2 = jnp.concatenate([tap(p1, k, L2, s2) for k in range(K2)],
                                axis=-1).reshape(L2 * N, K2 * GC1)
        h2 = (jnp.dot(slab2, w2_ref[...], preferred_element_type=jnp.float32)
              + b2).reshape(L2, N, GC2)

        # ---- maxpool2 (pooled length == 1): lane-dense (N, GC2) feature slab ----
        feats = maxpool_lead(h2, 1, pk2, ps2)[0]                 # (N, GC2)

        # ---- LSTM: input projection hoisted out of the serial recurrence ----
        gates_x = jnp.dot(feats, wih_ref[...],
                          preferred_element_type=jnp.float32) + blstm   # (N, 4H)
        # Per-timestep repack, hoisted off the 8-step serial chain:
        gx = [gates_x[t * B:(t + 1) * B, :] for t in range(T)]
        whh = whh_ref[...]                                        # (H, 4H), i|f|o|g

        h = jnp.zeros((B, H), jnp.float32)
        c = jnp.zeros((B, H), jnp.float32)
        hs = []
        for t in range(T):                       # statically unrolled recurrence
            gates = gx[t] + jnp.dot(h, whh, preferred_element_type=jnp.float32)
            sg = sigmoid_eup(gates[:, 0:3 * H])  # i, f, o  -> 3H lanes on EUP
            g = jnp.tanh(gates[:, 3 * H:4 * H])  # g        ->  H lanes on EUP
            i = sg[:, 0:H]
            f = sg[:, H:2 * H]
            o = sg[:, 2 * H:3 * H]
            c = f * c + i * g
            h = o * jnp.tanh(c)
            hs.append(h)
        hs = jnp.concatenate(hs, axis=0)         # (T*B, H), row = t*B + b

        # ---- final Linear, once, off the recurrence path ----
        out = jnp.dot(hs, wlinT, preferred_element_type=jnp.float32) + blin
        out_ref[...] = out[:, 0:O]

    return kernel


# ----------------- factory: one-time weight prep + jitted forward -----------------

def make_cnn_rnn_forward(weights, params):
    """Computes all kernel-friendly weight layouts ONCE and returns a jitted
    forward(x) that only does the per-call input unfold + a single pallas_call."""
    W1, b1, W2, b2 = weights['W1'], weights['b1'], weights['W2'], weights['b2']
    Wih, Whh = weights['Wih'], weights['Whh']
    bih, bhh = weights['bih'], weights['bhh']
    Wlin, blin = weights['Wlin'], weights['blin']

    G, C1, K1 = W1.shape[0], W1.shape[1], W1.shape[3]
    C2, K2 = W2.shape[1], W2.shape[3]
    H, O = Whh.shape[1], Wlin.shape[0]
    H4, GC1, GC2 = 4 * H, G * C1, G * C2
    s1, s2 = params['conv1_stride'], params['conv2_stride']
    pk1, ps1 = params['pool1_ksize'], params['pool1_stride']
    pk2, ps2 = params['pool2_ksize'], params['pool2_stride']
    assert params['rnn_n_layers'] == 1
    # dropout / rnn_dropout are identity (eval mode)

    # --- one-time weight re-layouts (hoisted out of the per-call path) ---
    eyeG = jnp.eye(G, dtype=jnp.float32)
    w1k = jnp.transpose(W1[:, :, 0, :], (2, 0, 1))                      # (K1, G, C1)
    W1u = jnp.einsum('pg,kgc->kpgc', eyeG, w1k).reshape(K1 * G, GC1)    # block-diag, taps folded
    w2k = jnp.transpose(W2, (3, 0, 2, 1))                               # (K2, G, C1, C2)
    W2u = jnp.einsum('pg,kgcd->kpcgd', eyeG, w2k).reshape(K2 * GC1, GC2)

    # LSTM gate reorder (i,f,g,o) -> (i,f,o,g): sigmoid on first 3H lanes, tanh on last H.
    perm = jnp.concatenate([jnp.arange(0, 2 * H),
                            jnp.arange(3 * H, 4 * H),
                            jnp.arange(2 * H, 3 * H)])
    WihT = jnp.transpose(Wih[perm, :])                                  # (D, 4H)
    WhhT = jnp.transpose(Whh[perm, :])                                  # (H, 4H)
    blstm = (bih + bhh)[perm].reshape(1, H4)

    # Pack the five tiny operands into one lane-padded array (fewer DMA descriptors).
    padW = max(128, GC1, GC2, H4, O)

    def pad_row(a):
        return jnp.pad(a, ((0, 0), (0, padW - a.shape[1])))

    misc = jnp.concatenate([
        pad_row(b1.reshape(1, GC1)),          # row 0
        pad_row(b2.reshape(1, GC2)),          # row 1
        pad_row(blstm),                       # row 2
        pad_row(jnp.transpose(Wlin)),         # rows 3 .. 3+H-1
        pad_row(blin.reshape(1, O)),          # row 3+H
    ], axis=0)

    prepared = (W1u, W2u, WihT, WhhT, misc)
    vmem = pl.BlockSpec(memory_space=pltpu.MemorySpace.VMEM)

    @jax.jit
    def forward(x):
        T, B, Gx, L = x.shape
        assert Gx == G
        N = T * B
        L1 = (L - K1) // s1 + 1
        Lp1 = (L1 - pk1) // ps1 + 1
        L2 = (Lp1 - K2) // s2 + 1
        Lp2 = (L2 - pk2) // ps2 + 1
        assert Lp2 == 1, "model requires pooled length 1 so feature dim == 16*conv2_out"

        # Per-call input prep (inside this one jit): (T,B,G,L) -> position-major
        # (L,N,G) -> unfolded conv1 slab (L1*N, K1*G).
        x_t = jnp.transpose(x.reshape(N, G, L), (2, 0, 1))
        taps = [x_t[k:(L1 - 1) * s1 + k + 1:s1] for k in range(K1)]
        slab1 = jnp.concatenate(taps, axis=-1).reshape(L1 * N, K1 * G)

        kernel = _make_fused_kernel((T, B, G, C1, C2, H, O),
                                    (K2, s2, pk1, ps1, pk2, ps2))
        # Single-shot, fully VMEM-resident call (footprint ~0.3 MiB: fine on
        # v5e/v6e/v7x). TODO(synk): for batches >> T*B=16, add a 1-D batch grid with
        # dimension_semantics=("parallel",) to use v7x's second TensorCore.
        out = pl.pallas_call(
            kernel,
            out_shape=jax.ShapeDtypeStruct((N, O), jnp.float32),
            in_specs=[vmem] * 6,
            out_specs=vmem,
        )(slab1, *prepared)
        return out.reshape(T, B, O)

    return forward


# ----------------- pure-JAX reference (for correctness check) -----------------

def ref_forward(x, weights, params):
    T, B, G, L = x.shape
    N = T * B
    xr = x.reshape(N, G, L)
    W1, b1, W2, b2 = weights['W1'], weights['b1'], weights['W2'], weights['b2']
    dn = ('NCH', 'OIH', 'NCH')
    neg_inf = jnp.array(-jnp.inf, jnp.float32)
    outs = []
    for g in range(G):
        h = jax.lax.conv_general_dilated(xr[:, g:g + 1, :], W1[g],
                                         (params['conv1_stride'],), 'VALID',
                                         dimension_numbers=dn) + b1[g][None, :, None]
        h = jax.lax.reduce_window(h, neg_inf, jax.lax.max,
                                  (1, 1, params['pool1_ksize']),
                                  (1, 1, params['pool1_stride']), 'VALID')
        h = jax.lax.conv_general_dilated(h, W2[g], (params['conv2_stride'],), 'VALID',
                                         dimension_numbers=dn) + b2[g][None, :, None]
        h = jax.lax.reduce_window(h, neg_inf, jax.lax.max,
                                  (1, 1, params['pool2_ksize']),
                                  (1, 1, params['pool2_stride']), 'VALID')
        outs.append(h)
    feats = jnp.concatenate(outs, axis=1).reshape(T, B, -1)

    Wih, Whh = weights['Wih'], weights['Whh']
    bih, bhh = weights['bih'], weights['bhh']
    H = Whh.shape[1]

    def step(carry, xt):
        h, c = carry
        gates = xt @ Wih.T + h @ Whh.T + bih + bhh
        i, f, gg, o = jnp.split(gates, 4, axis=-1)
        i, f, o = jax.nn.sigmoid(i), jax.nn.sigmoid(f), jax.nn.sigmoid(o)
        gg = jnp.tanh(gg)
        c = f * c + i * gg
        h = o * jnp.tanh(c)
        return (h, c), h

    z = jnp.zeros((B, H), jnp.float32)
    _, hs = jax.lax.scan(step, (z, z), feats)
    return hs @ weights['Wlin'].T + weights['blin']


if __name__ == "__main__":
    params = dict(conv1_in=1, conv1_out=4, conv1_ksize=3, conv1_stride=1,
                  conv2_out=8, conv2_ksize=3, conv2_stride=1,
                  pool1_ksize=2, pool1_stride=2,
                  pool2_ksize=5, pool2_stride=5,
                  rnn_hidden=32, rnn_n_layers=1, rnn_dropout=0.0,
                  linear_out=4, p_dropout=0.0)
    T, B, G, L = 8, 2, 16, 16
    C1, K1 = params['conv1_out'], params['conv1_ksize']
    C2, K2 = params['conv2_out'], params['conv2_ksize']
    H, O = params['rnn_hidden'], params['linear_out']
    D = G * C2   # = 128, LSTM input size

    key = jax.random.PRNGKey(0)
    ks = jax.random.split(key, 11)
    weights = {
        'W1':   jax.random.normal(ks[0], (G, C1, 1, K1), jnp.float32) * 0.3,
        'b1':   jax.random.normal(ks[1], (G, C1), jnp.float32) * 0.1,
        'W2':   jax.random.normal(ks[2], (G, C2, C1, K2), jnp.float32) * 0.2,
        'b2':   jax.random.normal(ks[3], (G, C2), jnp.float32) * 0.1,
        'Wih':  jax.random.normal(ks[4], (4 * H, D), jnp.float32) * 0.1,
        'Whh':  jax.random.normal(ks[5], (4 * H, H), jnp.float32) * 0.1,
        'bih':  jax.random.normal(ks[6], (4 * H,), jnp.float32) * 0.1,
        'bhh':  jax.random.normal(ks[7], (4 * H,), jnp.float32) * 0.1,
        'Wlin': jax.random.normal(ks[8], (O, H), jnp.float32) * 0.1,
        'blin': jax.random.normal(ks[9], (O,), jnp.float32) * 0.1,
    }
    x = jax.random.normal(ks[10], (T, B, G, L), jnp.float32)

    forward = make_cnn_rnn_forward(weights, params)   # weight re-layouts run ONCE here
    y = jax.block_until_ready(forward(x))
    y_ref = jax.block_until_ready(ref_forward(x, weights, params))
    np.testing.assert_allclose(np.asarray(y), np.asarray(y_ref), rtol=2e-2, atol=2e-2)
    print("KERNEL_OK")
</pallas_src>

<mosaic_0001>
module attributes {stable_mosaic.version = 11 : i64} {
  func.func @kernel(%arg0: memref<224x48xf32, #tpu.memory_space<vmem>>, %arg1: memref<48x64xf32, #tpu.memory_space<vmem>>, %arg2: memref<192x128xf32, #tpu.memory_space<vmem>>, %arg3: memref<128x128xf32, #tpu.memory_space<vmem>>, %arg4: memref<32x128xf32, #tpu.memory_space<vmem>>, %arg5: memref<36x128xf32, #tpu.memory_space<vmem>>, %arg6: memref<16x4xf32, #tpu.memory_space<vmem>>) attributes {dimension_semantics = [], scalar_prefetch = 0 : i64, scratch_operands = 0 : i64, tpu.core_type = #tpu.core_type<tc>} {
    %c0 = arith.constant 0 : index
    %c0_0 = arith.constant 0 : index
    %0 = vector.load %arg5[%c0, %c0_0] : memref<36x128xf32, #tpu.memory_space<vmem>>, vector<1x64xf32>
    %c1 = arith.constant 1 : index
    %c0_1 = arith.constant 0 : index
    %1 = vector.load %arg5[%c1, %c0_1] : memref<36x128xf32, #tpu.memory_space<vmem>>, vector<1x128xf32>
    %c2 = arith.constant 2 : index
    %c0_2 = arith.constant 0 : index
    %2 = vector.load %arg5[%c2, %c0_2] : memref<36x128xf32, #tpu.memory_space<vmem>>, vector<1x128xf32>
    %c3 = arith.constant 3 : index
    %c0_3 = arith.constant 0 : index
    %3 = vector.load %arg5[%c3, %c0_3] : memref<36x128xf32, #tpu.memory_space<vmem>>, vector<32x128xf32>
    %c35 = arith.constant 35 : index
    %c0_4 = arith.constant 0 : index
    %4 = vector.load %arg5[%c35, %c0_4] : memref<36x128xf32, #tpu.memory_space<vmem>>, vector<1x128xf32>
    %c0_5 = arith.constant 0 : index
    %c0_6 = arith.constant 0 : index
    %5 = vector.load %arg0[%c0_5, %c0_6] : memref<224x48xf32, #tpu.memory_space<vmem>>, vector<224x48xf32>
    %c0_7 = arith.constant 0 : index
    %c0_8 = arith.constant 0 : index
    %6 = vector.load %arg1[%c0_7, %c0_8] : memref<48x64xf32, #tpu.memory_space<vmem>>, vector<48x64xf32>
    %cst = arith.constant dense<0.000000e+00> : vector<224x64xf32>
    %7 = tpu.matmul %5, %6, %cst {dimension_numbers = #tpu.dot_dimension_numbers<[1], [0], [0], [1], [0, 0, 1, 1], [], []>} : vector<224x48xf32>, vector<48x64xf32>, vector<224x64xf32> -> vector<224x64xf32>
    %8 = vector.broadcast %0 : vector<1x64xf32> to vector<224x64xf32>
    %9 = arith.addf %7, %8 : vector<224x64xf32>
    %10 = vector.shape_cast %9 : vector<224x64xf32> to vector<14x16x64xf32>
    %11 = vector.shape_cast %10 : vector<14x16x64xf32> to vector<7x2x16x64xf32>
    %12 = vector.extract_strided_slice %11 {offsets = [0, 0, 0, 0], sizes = [7, 1, 16, 64], strides = [1, 1, 1, 1]} : vector<7x2x16x64xf32> to vector<7x1x16x64xf32>
    %13 = vector.shape_cast %12 : vector<7x1x16x64xf32> to vector<7x16x64xf32>
    %14 = vector.extract_strided_slice %11 {offsets = [0, 1, 0, 0], sizes = [7, 1, 16, 64], strides = [1, 1, 1, 1]} : vector<7x2x16x64xf32> to vector<7x1x16x64xf32>
    %15 = vector.shape_cast %14 : vector<7x1x16x64xf32> to vector<7x16x64xf32>
    %16 = arith.maximumf %13, %15 : vector<7x16x64xf32>
    %17 = vector.extract_strided_slice %16 {offsets = [0, 0, 0], sizes = [5, 16, 64], strides = [1, 1, 1]} : vector<7x16x64xf32> to vector<5x16x64xf32>
    %18 = vector.extract_strided_slice %16 {offsets = [1, 0, 0], sizes = [5, 16, 64], strides = [1, 1, 1]} : vector<7x16x64xf32> to vector<5x16x64xf32>
    %19 = vector.extract_strided_slice %16 {offsets = [2, 0, 0], sizes = [5, 16, 64], strides = [1, 1, 1]} : vector<7x16x64xf32> to vector<5x16x64xf32>
    %20 = tpu.concatenate %17, %18, %19 in 2 : vector<5x16x64xf32>, vector<5x16x64xf32>, vector<5x16x64xf32> -> vector<5x16x192xf32>
    %21 = vector.shape_cast %20 : vector<5x16x192xf32> to vector<80x192xf32>
    %c0_9 = arith.constant 0 : index
    %c0_10 = arith.constant 0 : index
    %22 = vector.load %arg2[%c0_9, %c0_10] : memref<192x128xf32, #tpu.memory_space<vmem>>, vector<192x128xf32>
    %cst_11 = arith.constant dense<0.000000e+00> : vector<80x128xf32>
    %23 = tpu.matmul %21, %22, %cst_11 {dimension_numbers = #tpu.dot_dimension_numbers<[1], [0], [0], [1], [0, 0, 1, 1], [], []>} : vector<80x192xf32>, vector<192x128xf32>, vector<80x128xf32> -> vector<80x128xf32>
    %24 = vector.broadcast %1 : vector<1x128xf32> to vector<80x128xf32>
    %25 = arith.addf %23, %24 : vector<80x128xf32>
    %26 = vector.shape_cast %25 : vector<80x128xf32> to vector<5x16x128xf32>
    %27 = vector.shape_cast %26 : vector<5x16x128xf32> to vector<1x5x16x128xf32>
    %28 = vector.extract_strided_slice %27 {offsets = [0, 0, 0, 0], sizes = [1, 1, 16, 128], strides = [1, 1, 1, 1]} : vector<1x5x16x128xf32> to vector<1x1x16x128xf32>
    %29 = vector.shape_cast %28 : vector<1x1x16x128xf32> to vector<1x16x128xf32>
    %30 = vector.extract_strided_slice %27 {offsets = [0, 1, 0, 0], sizes = [1, 1, 16, 128], strides = [1, 1, 1, 1]} : vector<1x5x16x128xf32> to vector<1x1x16x128xf32>
    %31 = vector.shape_cast %30 : vector<1x1x16x128xf32> to vector<1x16x128xf32>
    %32 = arith.maximumf %29, %31 : vector<1x16x128xf32>
    %33 = vector.extract_strided_slice %27 {offsets = [0, 2, 0, 0], sizes = [1, 1, 16, 128], strides = [1, 1, 1, 1]} : vector<1x5x16x128xf32> to vector<1x1x16x128xf32>
    %34 = vector.shape_cast %33 : vector<1x1x16x128xf32> to vector<1x16x128xf32>
    %35 = arith.maximumf %32, %34 : vector<1x16x128xf32>
    %36 = vector.extract_strided_slice %27 {offsets = [0, 3, 0, 0], sizes = [1, 1, 16, 128], strides = [1, 1, 1, 1]} : vector<1x5x16x128xf32> to vector<1x1x16x128xf32>
    %37 = vector.shape_cast %36 : vector<1x1x16x128xf32> to vector<1x16x128xf32>
    %38 = arith.maximumf %35, %37 : vector<1x16x128xf32>
    %39 = vector.extract_strided_slice %27 {offsets = [0, 4, 0, 0], sizes = [1, 1, 16, 128], strides = [1, 1, 1, 1]} : vector<1x5x16x128xf32> to vector<1x1x16x128xf32>
    %40 = vector.shape_cast %39 : vector<1x1x16x128xf32> to vector<1x16x128xf32>
    %41 = arith.maximumf %38, %40 : vector<1x16x128xf32>
    %42 = vector.shape_cast %41 : vector<1x16x128xf32> to vector<16x128xf32>
    %c0_12 = arith.constant 0 : index
    %c0_13 = arith.constant 0 : index
    %43 = vector.load %arg3[%c0_12, %c0_13] : memref<128x128xf32, #tpu.memory_space<vmem>>, vector<128x128xf32>
    %cst_14 = arith.constant dense<0.000000e+00> : vector<16x128xf32>
    %44 = tpu.matmul %42, %43, %cst_14 {dimension_numbers = #tpu.dot_dimension_numbers<[1], [0], [0], [1], [0, 0, 1, 1], [], []>} : vector<16x128xf32>, vector<128x128xf32>, vector<16x128xf32> -> vector<16x128xf32>
    %45 = vector.broadcast %2 : vector<1x128xf32> to vector<16x128xf32>
    %46 = arith.addf %44, %45 : vector<16x128xf32>
    %47 = vector.extract_strided_slice %46 {offsets = [0, 0], sizes = [2, 128], strides = [1, 1]} : vector<16x128xf32> to vector<2x128xf32>
    %48 = vector.extract_strided_slice %46 {offsets = [2, 0], sizes = [2, 128], strides = [1, 1]} : vector<16x128xf32> to vector<2x128xf32>
    %49 = vector.extract_strided_slice %46 {offsets = [4, 0], sizes = [2, 128], strides = [1, 1]} : vector<16x128xf32> to vector<2x128xf32>
    %50 = vector.extract_strided_slice %46 {offsets = [6, 0], sizes = [2, 128], strides = [1, 1]} : vector<16x128xf32> to vector<2x128xf32>
    %51 = vector.extract_strided_slice %46 {offsets = [8, 0], sizes = [2, 128], strides = [1, 1]} : vector<16x128xf32> to vector<2x128xf32>
    %52 = vector.extract_strided_slice %46 {offsets = [10, 0], sizes = [2, 128], strides = [1, 1]} : vector<16x128xf32> to vector<2x128xf32>
    %53 = vector.extract_strided_slice %46 {offsets = [12, 0], sizes = [2, 128], strides = [1, 1]} : vector<16x128xf32> to vector<2x128xf32>
    %54 = vector.extract_strided_slice %46 {offsets = [14, 0], sizes = [2, 128], strides = [1, 1]} : vector<16x128xf32> to vector<2x128xf32>
    %c0_15 = arith.constant 0 : index
    %c0_16 = arith.constant 0 : index
    %55 = vector.load %arg4[%c0_15, %c0_16] : memref<32x128xf32, #tpu.memory_space<vmem>>, vector<32x128xf32>
    %cst_17 = arith.constant 0.000000e+00 : f32
    %56 = vector.broadcast %cst_17 : f32 to vector<2x32xf32>
    %cst_18 = arith.constant 0.000000e+00 : f32
    %57 = vector.broadcast %cst_18 : f32 to vector<2x32xf32>
    %cst_19 = arith.constant dense<0.000000e+00> : vector<2x128xf32>
    %58 = tpu.matmul %56, %55, %cst_19 {dimension_numbers = #tpu.dot_dimension_numbers<[1], [0], [0], [1], [0, 0, 1, 1], [], []>} : vector<2x32xf32>, vector<32x128xf32>, vector<2x128xf32> -> vector<2x128xf32>
    %59 = arith.addf %47, %58 : vector<2x128xf32>
    %60 = vector.extract_strided_slice %59 {offsets = [0, 0], sizes = [2, 96], strides = [1, 1]} : vector<2x128xf32> to vector<2x96xf32>
    %cst_20 = arith.constant 0.000000e+00 : f32
    %61 = vector.broadcast %cst_20 : f32 to vector<2x96xf32>
    %62 = arith.subf %61, %60 : vector<2x96xf32>
    %63 = math.exp %62 : vector<2x96xf32>
    %cst_21 = arith.constant 1.000000e+00 : f32
    %64 = vector.broadcast %cst_21 : f32 to vector<2x96xf32>
    %65 = arith.addf %64, %63 : vector<2x96xf32>
    %66 = tpu.reciprocal %65 {approx = true} : vector<2x96xf32> -> vector<2x96xf32>
    %67 = vector.extract_strided_slice %59 {offsets = [0, 96], sizes = [2, 32], strides = [1, 1]} : vector<2x128xf32> to vector<2x32xf32>
    %68 = math.tanh %67 : vector<2x32xf32>
    %69 = vector.extract_strided_slice %66 {offsets = [0, 0], sizes = [2, 32], strides = [1, 1]} : vector<2x96xf32> to vector<2x32xf32>
    %70 = vector.extract_strided_slice %66 {offsets = [0, 32], sizes = [2, 32], strides = [1, 1]} : vector<2x96xf32> to vector<2x32xf32>
    %71 = vector.extract_strided_slice %66 {offsets = [0, 64], sizes = [2, 32], strides = [1, 1]} : vector<2x96xf32> to vector<2x32xf32>
    %72 = arith.mulf %70, %57 : vector<2x32xf32>
    %73 = arith.mulf %69, %68 : vector<2x32xf32>
    %74 = arith.addf %72, %73 : vector<2x32xf32>
    %75 = math.tanh %74 : vector<2x32xf32>
    %76 = arith.mulf %71, %75 : vector<2x32xf32>
    %cst_22 = arith.constant dense<0.000000e+00> : vector<2x128xf32>
    %77 = tpu.matmul %76, %55, %cst_22 {dimension_numbers = #tpu.dot_dimension_numbers<[1], [0], [0], [1], [0, 0, 1, 1], [], []>} : vector<2x32xf32>, vector<32x128xf32>, vector<2x128xf32> -> vector<2x128xf32>
    %78 = arith.addf %48, %77 : vector<2x128xf32>
    %79 = vector.extract_strided_slice %78 {offsets = [0, 0], sizes = [2, 96], strides = [1, 1]} : vector<2x128xf32> to vector<2x96xf32>
    %cst_23 = arith.constant 0.000000e+00 : f32
    %80 = vector.broadcast %cst_23 : f32 to vector<2x96xf32>
    %81 = arith.subf %80, %79 : vector<2x96xf32>
    %82 = math.exp %81 : vector<2x96xf32>
    %cst_24 = arith.constant 1.000000e+00 : f32
    %83 = vector.broadcast %cst_24 : f32 to vector<2x96xf32>
    %84 = arith.addf %83, %82 : vector<2x96xf32>
    %85 = tpu.reciprocal %84 {approx = true} : vector<2x96xf32> -> vector<2x96xf32>
    %86 = vector.extract_strided_slice %78 {offsets = [0, 96], sizes = [2, 32], strides = [1, 1]} : vector<2x128xf32> to vector<2x32xf32>
    %87 = math.tanh %86 : vector<2x32xf32>
    %88 = vector.extract_strided_slice %85 {offsets = [0, 0], sizes = [2, 32], strides = [1, 1]} : vector<2x96xf32> to vector<2x32xf32>
    %89 = vector.extract_strided_slice %85 {offsets = [0, 32], sizes = [2, 32], strides = [1, 1]} : vector<2x96xf32> to vector<2x32xf32>
    %90 = vector.extract_strided_slice %85 {offsets = [0, 64], sizes = [2, 32], strides = [1, 1]} : vector<2x96xf32> to vector<2x32xf32>
    %91 = arith.mulf %89, %74 : vector<2x32xf32>
    %92 = arith.mulf %88, %87 : vector<2x32xf32>
    %93 = arith.addf %91, %92 : vector<2x32xf32>
    %94 = math.tanh %93 : vector<2x32xf32>
    %95 = arith.mulf %90, %94 : vector<2x32xf32>
    %cst_25 = arith.constant dense<0.000000e+00> : vector<2x128xf32>
    %96 = tpu.matmul %95, %55, %cst_25 {dimension_numbers = #tpu.dot_dimension_numbers<[1], [0], [0], [1], [0, 0, 1, 1], [], []>} : vector<2x32xf32>, vector<32x128xf32>, vector<2x128xf32> -> vector<2x128xf32>
    %97 = arith.addf %49, %96 : vector<2x128xf32>
    %98 = vector.extract_strided_slice %97 {offsets = [0, 0], sizes = [2, 96], strides = [1, 1]} : vector<2x128xf32> to vector<2x96xf32>
    %cst_26 = arith.constant 0.000000e+00 : f32
    %99 = vector.broadcast %cst_26 : f32 to vector<2x96xf32>
    %100 = arith.subf %99, %98 : vector<2x96xf32>
    %101 = math.exp %100 : vector<2x96xf32>
    %cst_27 = arith.constant 1.000000e+00 : f32
    %102 = vector.broadcast %cst_27 : f32 to vector<2x96xf32>
    %103 = arith.addf %102, %101 : vector<2x96xf32>
    %104 = tpu.reciprocal %103 {approx = true} : vector<2x96xf32> -> vector<2x96xf32>
    %105 = vector.extract_strided_slice %97 {offsets = [0, 96], sizes = [2, 32], strides = [1, 1]} : vector<2x128xf32> to vector<2x32xf32>
    %106 = math.tanh %105 : vector<2x32xf32>
    %107 = vector.extract_strided_slice %104 {offsets = [0, 0], sizes = [2, 32], strides = [1, 1]} : vector<2x96xf32> to vector<2x32xf32>
    %108 = vector.extract_strided_slice %104 {offsets = [0, 32], sizes = [2, 32], strides = [1, 1]} : vector<2x96xf32> to vector<2x32xf32>
    %109 = vector.extract_strided_slice %104 {offsets = [0, 64], sizes = [2, 32], strides = [1, 1]} : vector<2x96xf32> to vector<2x32xf32>
    %110 = arith.mulf %108, %93 : vector<2x32xf32>
    %111 = arith.mulf %107, %106 : vector<2x32xf32>
    %112 = arith.addf %110, %111 : vector<2x32xf32>
    %113 = math.tanh %112 : vector<2x32xf32>
    %114 = arith.mulf %109, %113 : vector<2x32xf32>
    %cst_28 = arith.constant dense<0.000000e+00> : vector<2x128xf32>
    %115 = tpu.matmul %114, %55, %cst_28 {dimension_numbers = #tpu.dot_dimension_numbers<[1], [0], [0], [1], [0, 0, 1, 1], [], []>} : vector<2x32xf32>, vector<32x128xf32>, vector<2x128xf32> -> vector<2x128xf32>
    %116 = arith.addf %50, %115 : vector<2x128xf32>
    %117 = vector.extract_strided_slice %116 {offsets = [0, 0], sizes = [2, 96], strides = [1, 1]} : vector<2x128xf32> to vector<2x96xf32>
    %cst_29 = arith.constant 0.000000e+00 : f32
    %118 = vector.broadcast %cst_29 : f32 to vector<2x96xf32>
    %119 = arith.subf %118, %117 : vector<2x96xf32>
    %120 = math.exp %119 : vector<2x96xf32>
    %cst_30 = arith.constant 1.000000e+00 : f32
    %121 = vector.broadcast %cst_30 : f32 to vector<2x96xf32>
    %122 = arith.addf %121, %120 : vector<2x96xf32>
    %123 = tpu.reciprocal %122 {approx = true} : vector<2x96xf32> -> vector<2x96xf32>
    %124 = vector.extract_strided_slice %116 {offsets = [0, 96], sizes = [2, 32], strides = [1, 1]} : vector<2x128xf32> to vector<2x32xf32>
    %125 = math.tanh %124 : vector<2x32xf32>
    %126 = vector.extract_strided_slice %123 {offsets = [0, 0], sizes = [2, 32], strides = [1, 1]} : vector<2x96xf32> to vector<2x32xf32>
    %127 = vector.extract_strided_slice %123 {offsets = [0, 32], sizes = [2, 32], strides = [1, 1]} : vector<2x96xf32> to vector<2x32xf32>
    %128 = vector.extract_strided_slice %123 {offsets = [0, 64], sizes = [2, 32], strides = [1, 1]} : vector<2x96xf32> to vector<2x32xf32>
    %129 = arith.mulf %127, %112 : vector<2x32xf32>
    %130 = arith.mulf %126, %125 : vector<2x32xf32>
    %131 = arith.addf %129, %130 : vector<2x32xf32>
    %132 = math.tanh %131 : vector<2x32xf32>
    %133 = arith.mulf %128, %132 : vector<2x32xf32>
    %cst_31 = arith.constant dense<0.000000e+00> : vector<2x128xf32>
    %134 = tpu.matmul %133, %55, %cst_31 {dimension_numbers = #tpu.dot_dimension_numbers<[1], [0], [0], [1], [0, 0, 1, 1], [], []>} : vector<2x32xf32>, vector<32x128xf32>, vector<2x128xf32> -> vector<2x128xf32>
    %135 = arith.addf %51, %134 : vector<2x128xf32>
    %136 = vector.extract_strided_slice %135 {offsets = [0, 0], sizes = [2, 96], strides = [1, 1]} : vector<2x128xf32> to vector<2x96xf32>
    %cst_32 = arith.constant 0.000000e+00 : f32
    %137 = vector.broadcast %cst_32 : f32 to vector<2x96xf32>
    %138 = arith.subf %137, %136 : vector<2x96xf32>
    %139 = math.exp %138 : vector<2x96xf32>
    %cst_33 = arith.constant 1.000000e+00 : f32
    %140 = vector.broadcast %cst_33 : f32 to vector<2x96xf32>
    %141 = arith.addf %140, %139 : vector<2x96xf32>
    %142 = tpu.reciprocal %141 {approx = true} : vector<2x96xf32> -> vector<2x96xf32>
    %143 = vector.extract_strided_slice %135 {offsets = [0, 96], sizes = [2, 32], strides = [1, 1]} : vector<2x128xf32> to vector<2x32xf32>
    %144 = math.tanh %143 : vector<2x32xf32>
    %145 = vector.extract_strided_slice %142 {offsets = [0, 0], sizes = [2, 32], strides = [1, 1]} : vector<2x96xf32> to vector<2x32xf32>
    %146 = vector.extract_strided_slice %142 {offsets = [0, 32], sizes = [2, 32], strides = [1, 1]} : vector<2x96xf32> to vector<2x32xf32>
    %147 = vector.extract_strided_slice %142 {offsets = [0, 64], sizes = [2, 32], strides = [1, 1]} : vector<2x96xf32> to vector<2x32xf32>
    %148 = arith.mulf %146, %131 : vector<2x32xf32>
    %149 = arith.mulf %145, %144 : vector<2x32xf32>
    %150 = arith.addf %148, %149 : vector<2x32xf32>
    %151 = math.tanh %150 : vector<2x32xf32>
    %152 = arith.mulf %147, %151 : vector<2x32xf32>
    %cst_34 = arith.constant dense<0.000000e+00> : vector<2x128xf32>
    %153 = tpu.matmul %152, %55, %cst_34 {dimension_numbers = #tpu.dot_dimension_numbers<[1], [0], [0], [1], [0, 0, 1, 1], [], []>} : vector<2x32xf32>, vector<32x128xf32>, vector<2x128xf32> -> vector<2x128xf32>
    %154 = arith.addf %52, %153 : vector<2x128xf32>
    %155 = vector.extract_strided_slice %154 {offsets = [0, 0], sizes = [2, 96], strides = [1, 1]} : vector<2x128xf32> to vector<2x96xf32>
    %cst_35 = arith.constant 0.000000e+00 : f32
    %156 = vector.broadcast %cst_35 : f32 to vector<2x96xf32>
    %157 = arith.subf %156, %155 : vector<2x96xf32>
    %158 = math.exp %157 : vector<2x96xf32>
    %cst_36 = arith.constant 1.000000e+00 : f32
    %159 = vector.broadcast %cst_36 : f32 to vector<2x96xf32>
    %160 = arith.addf %159, %158 : vector<2x96xf32>
    %161 = tpu.reciprocal %160 {approx = true} : vector<2x96xf32> -> vector<2x96xf32>
    %162 = vector.extract_strided_slice %154 {offsets = [0, 96], sizes = [2, 32], strides = [1, 1]} : vector<2x128xf32> to vector<2x32xf32>
    %163 = math.tanh %162 : vector<2x32xf32>
    %164 = vector.extract_strided_slice %161 {offsets = [0, 0], sizes = [2, 32], strides = [1, 1]} : vector<2x96xf32> to vector<2x32xf32>
    %165 = vector.extract_strided_slice %161 {offsets = [0, 32], sizes = [2, 32], strides = [1, 1]} : vector<2x96xf32> to vector<2x32xf32>
    %166 = vector.extract_strided_slice %161 {offsets = [0, 64], sizes = [2, 32], strides = [1, 1]} : vector<2x96xf32> to vector<2x32xf32>
    %167 = arith.mulf %165, %150 : vector<2x32xf32>
    %168 = arith.mulf %164, %163 : vector<2x32xf32>
    %169 = arith.addf %167, %168 : vector<2x32xf32>
    %170 = math.tanh %169 : vector<2x32xf32>
    %171 = arith.mulf %166, %170 : vector<2x32xf32>
    %cst_37 = arith.constant dense<0.000000e+00> : vector<2x128xf32>
    %172 = tpu.matmul %171, %55, %cst_37 {dimension_numbers = #tpu.dot_dimension_numbers<[1], [0], [0], [1], [0, 0, 1, 1], [], []>} : vector<2x32xf32>, vector<32x128xf32>, vector<2x128xf32> -> vector<2x128xf32>
    %173 = arith.addf %53, %172 : vector<2x128xf32>
    %174 = vector.extract_strided_slice %173 {offsets = [0, 0], sizes = [2, 96], strides = [1, 1]} : vector<2x128xf32> to vector<2x96xf32>
    %cst_38 = arith.constant 0.000000e+00 : f32
    %175 = vector.broadcast %cst_38 : f32 to vector<2x96xf32>
    %176 = arith.subf %175, %174 : vector<2x96xf32>
    %177 = math.exp %176 : vector<2x96xf32>
    %cst_39 = arith.constant 1.000000e+00 : f32
    %178 = vector.broadcast %cst_39 : f32 to vector<2x96xf32>
    %179 = arith.addf %178, %177 : vector<2x96xf32>
    %180 = tpu.reciprocal %179 {approx = true} : vector<2x96xf32> -> vector<2x96xf32>
    %181 = vector.extract_strided_slice %173 {offsets = [0, 96], sizes = [2, 32], strides = [1, 1]} : vector<2x128xf32> to vector<2x32xf32>
    %182 = math.tanh %181 : vector<2x32xf32>
    %183 = vector.extract_strided_slice %180 {offsets = [0, 0], sizes = [2, 32], strides = [1, 1]} : vector<2x96xf32> to vector<2x32xf32>
    %184 = vector.extract_strided_slice %180 {offsets = [0, 32], sizes = [2, 32], strides = [1, 1]} : vector<2x96xf32> to vector<2x32xf32>
    %185 = vector.extract_strided_slice %180 {offsets = [0, 64], sizes = [2, 32], strides = [1, 1]} : vector<2x96xf32> to vector<2x32xf32>
    %186 = arith.mulf %184, %169 : vector<2x32xf32>
    %187 = arith.mulf %183, %182 : vector<2x32xf32>
    %188 = arith.addf %186, %187 : vector<2x32xf32>
    %189 = math.tanh %188 : vector<2x32xf32>
    %190 = arith.mulf %185, %189 : vector<2x32xf32>
    %cst_40 = arith.constant dense<0.000000e+00> : vector<2x128xf32>
    %191 = tpu.matmul %190, %55, %cst_40 {dimension_numbers = #tpu.dot_dimension_numbers<[1], [0], [0], [1], [0, 0, 1, 1], [], []>} : vector<2x32xf32>, vector<32x128xf32>, vector<2x128xf32> -> vector<2x128xf32>
    %192 = arith.addf %54, %191 : vector<2x128xf32>
    %193 = vector.extract_strided_slice %192 {offsets = [0, 0], sizes = [2, 96], strides = [1, 1]} : vector<2x128xf32> to vector<2x96xf32>
    %cst_41 = arith.constant 0.000000e+00 : f32
    %194 = vector.broadcast %cst_41 : f32 to vector<2x96xf32>
    %195 = arith.subf %194, %193 : vector<2x96xf32>
    %196 = math.exp %195 : vector<2x96xf32>
    %cst_42 = arith.constant 1.000000e+00 : f32
    %197 = vector.broadcast %cst_42 : f32 to vector<2x96xf32>
    %198 = arith.addf %197, %196 : vector<2x96xf32>
    %199 = tpu.reciprocal %198 {approx = true} : vector<2x96xf32> -> vector<2x96xf32>
    %200 = vector.extract_strided_slice %192 {offsets = [0, 96], sizes = [2, 32], strides = [1, 1]} : vector<2x128xf32> to vector<2x32xf32>
    %201 = math.tanh %200 : vector<2x32xf32>
    %202 = vector.extract_strided_slice %199 {offsets = [0, 0], sizes = [2, 32], strides = [1, 1]} : vector<2x96xf32> to vector<2x32xf32>
    %203 = vector.extract_strided_slice %199 {offsets = [0, 32], sizes = [2, 32], strides = [1, 1]} : vector<2x96xf32> to vector<2x32xf32>
    %204 = vector.extract_strided_slice %199 {offsets = [0, 64], sizes = [2, 32], strides = [1, 1]} : vector<2x96xf32> to vector<2x32xf32>
    %205 = arith.mulf %203, %188 : vector<2x32xf32>
    %206 = arith.mulf %202, %201 : vector<2x32xf32>
    %207 = arith.addf %205, %206 : vector<2x32xf32>
    %208 = math.tanh %207 : vector<2x32xf32>
    %209 = arith.mulf %204, %208 : vector<2x32xf32>
    %210 = tpu.concatenate %76, %95, %114, %133, %152, %171, %190, %209 in 0 : vector<2x32xf32>, vector<2x32xf32>, vector<2x32xf32>, vector<2x32xf32>, vector<2x32xf32>, vector<2x32xf32>, vector<2x32xf32>, vector<2x32xf32> -> vector<16x32xf32>
    %cst_43 = arith.constant dense<0.000000e+00> : vector<16x128xf32>
    %211 = tpu.matmul %210, %3, %cst_43 {dimension_numbers = #tpu.dot_dimension_numbers<[1], [0], [0], [1], [0, 0, 1, 1], [], []>} : vector<16x32xf32>, vector<32x128xf32>, vector<16x128xf32> -> vector<16x128xf32>
    %212 = vector.broadcast %4 : vector<1x128xf32> to vector<16x128xf32>
    %213 = arith.addf %211, %212 : vector<16x128xf32>
    %214 = vector.extract_strided_slice %213 {offsets = [0, 0], sizes = [16, 4], strides = [1, 1]} : vector<16x128xf32> to vector<16x4xf32>
    %c0_44 = arith.constant 0 : index
    %c0_45 = arith.constant 0 : index
    %215 = vector.load %arg6[%c0_44, %c0_45] : memref<16x4xf32, #tpu.memory_space<vmem>>, vector<16x4xf32>
    tpu.vector_store %arg6[%c0_44, %c0_45], %214 {strides = array<i32>} : memref<16x4xf32, #tpu.memory_space<vmem>>, vector<16x4xf32>,
    return
  }
}

</mosaic_0001>

<bundles_post_ra>
// kernel: forward.1
= control target key start
LH: loop header
LB: loop body
LE: loop exit
PB: predicated region body
PF: predicated region fallthrough
CT: control target
= control target key end

     0   :  { %vm69_vm0 = vcmask 392192   ;;  %v2041_v34 = vmov 0.0   ;;  %vm413_vm1 = vcmask 523264   ;;  %vm2043_vm2 = vmmov 0   ;;  %s2044_s27 = smov 32   ;;  %s2672_s1 = inlined_call_operand.vmem [shape: f32[48,64], index: 1, kind: input, shape index: {}]   ;;  %s2673_s0 = inlined_call_operand.vmem [shape: f32[224,48], index: 0, kind: input, shape index: {}]   ;;  %s2674_s2 = inlined_call_operand.vmem [shape: f32[192,128], index: 2, kind: input, shape index: {}]   ;;  %s2675_s5 = inlined_call_operand.vmem [shape: f32[36,128], index: 5, kind: input, shape index: {}]   ;;  %s2676_s3 = inlined_call_operand.vmem [shape: f32[128,128], index: 3, kind: input, shape index: {}]   ;;  %s2677_s4 = inlined_call_operand.vmem [shape: f32[32,128], index: 4, kind: input, shape index: {}]   ;;  %s2678_s6 = inlined_call_operand.vmem [shape: f32[16,4], index: 6, kind: output, shape index: {}]  }
   0x1   :  { %v64_v0 = vld [vmem:[%s2672_s1 + $0x28] sm:$0xff]  ;;  %v63_v1 = vld [vmem:[%s2672_s1 + $0x20] sm:$0xff]  ;;  %v62_v2 = vld [vmem:[%s2672_s1 + $0x18] sm:$0xff]  ;;  %474 = vmatprep.subr.mxu1 %v2041_v34  ;;  %vm696_vm3 = vcmask 261120   ;;  %vm1531_vm4 = vcmask 1041408   ;;  %vm1533_vm5 = vcmask 1043456  }
   0x2   :  { %1785 = vmatprep.subr.mxu0 %v64_v0  ;;  %v31_v3 = vld [vmem:[%s2673_s0] sm:$0xff]  ;;  %v61_v4 = vld [vmem:[%s2672_s1 + $0x10] sm:$0xff]  ;;  %v60_v5 = vld [vmem:[%s2672_s1 + $0x8] sm:$0xff]  ;;  %vm1535_vm6 = vcmask 1045504   ;;  %vm1629_vm7 = vcmask 31744  }
   0x3   :  { %1786 = vmatpush3.msra.mxu0 %v64_v0  ;;  %1797 = vmatprep.mubr.msk.f32.mxu0 %vm69_vm0, %v31_v3  ;;  %v59_v6 = vld [vmem:[%s2672_s1] sm:$0xff]  ;;  %v32_v7 = vld [vmem:[%s2673_s0 + $0x8] sm:$0xff]  ;;  %v33_v8 = vld [vmem:[%s2673_s0 + $0x10] sm:$0xff] }
   0x4   :  { %1787 = vmatprep.subr.mxu0 %v63_v1  ;;  %v34_v9 = vld [vmem:[%s2673_s0 + $0x18] sm:$0xff]  ;;  %v35_v10 = vld [vmem:[%s2673_s0 + $0x20] sm:$0xff]  ;;  %v36_v11 = vld [vmem:[%s2673_s0 + $0x28] sm:$0xff] }
   0x5   :  { %1788 = vmatpush3.msra.mxu0 %v63_v1  ;;  %v37_v12 = vld [vmem:[%s2673_s0 + $0x30] sm:$0xff]  ;;  %v38_v13 = vld [vmem:[%s2673_s0 + $0x38] sm:$0xff]  ;;  %v39_v14 = vld [vmem:[%s2673_s0 + $0x40] sm:$0xff] }
   0x6   :  { %1789 = vmatprep.subr.mxu0 %v62_v2  ;;  %v40_v15 = vld [vmem:[%s2673_s0 + $0x48] sm:$0xff]  ;;  %v41_v16 = vld [vmem:[%s2673_s0 + $0x50] sm:$0xff]  ;;  %v42_v17 = vld [vmem:[%s2673_s0 + $0x58] sm:$0xff] }
   0x7   :  { %1790 = vmatpush3.msra.mxu0 %v62_v2  ;;  %v43_v18 = vld [vmem:[%s2673_s0 + $0x60] sm:$0xff]  ;;  %v44_v19 = vld [vmem:[%s2673_s0 + $0x68] sm:$0xff]  ;;  %v45_v20 = vld [vmem:[%s2673_s0 + $0x70] sm:$0xff] }
   0x8   :  { %1791 = vmatprep.subr.mxu0 %v61_v4  ;;  %v46_v21 = vld [vmem:[%s2673_s0 + $0x78] sm:$0xff]  ;;  %v47_v22 = vld [vmem:[%s2673_s0 + $0x80] sm:$0xff]  ;;  %v48_v23 = vld [vmem:[%s2673_s0 + $0x88] sm:$0xff] }
   0x9   :  { %1792 = vmatpush3.msra.mxu0 %v61_v4  ;;  %v49_v24 = vld [vmem:[%s2673_s0 + $0x90] sm:$0xff]  ;;  %v50_v25 = vld [vmem:[%s2673_s0 + $0x98] sm:$0xff]  ;;  %v51_v26 = vld [vmem:[%s2673_s0 + $0xa0] sm:$0xff] }
   0xa   :  { %1793 = vmatprep.subr.mxu0 %v60_v5  ;;  %v52_v27 = vld [vmem:[%s2673_s0 + $0xa8] sm:$0xff]  ;;  %v53_v28 = vld [vmem:[%s2673_s0 + $0xb0] sm:$0xff]  ;;  %v54_v29 = vld [vmem:[%s2673_s0 + $0xb8] sm:$0xff] }
   0xb   :  { %1794 = vmatpush3.msra.mxu0 %v60_v5  ;;  %v55_v30 = vld [vmem:[%s2673_s0 + $0xc0] sm:$0xff]  ;;  %v56_v31 = vld [vmem:[%s2673_s0 + $0xc8] sm:$0xff]  ;;  %v57_v32 = vld [vmem:[%s2673_s0 + $0xd0] sm:$0xff] }
   0xc   :  { %1795 = vmatprep.subr.mxu0 %v59_v6  ;;  %v58_v33 = vld [vmem:[%s2673_s0 + $0xd8] sm:$0xff]  ;;  %v438_v36 = vld [vmem:[%s2674_s2 + $0x70] sm:$0xff]  ;;  %v437_v37 = vld [vmem:[%s2674_s2 + $0x68] sm:$0xff] }
   0xd   :  { %1796 = vmatpush3.msra.mxu0 %v59_v6  ;;  %v439_v35 = vld [vmem:[%s2674_s2 + $0x78] sm:$0xff]  ;;  %v436_v38 = vld [vmem:[%s2674_s2 + $0x60] sm:$0xff]  ;;  %v434_v40 = vld [vmem:[%s2674_s2 + $0x50] sm:$0xff] }
   0xe   :  { %1798 = vmatmul.mubr.msk.f32.vlgmr.msra.gmra.mxu0 %vm69_vm0, %v32_v7  ;;  %475 = vmatpush1.msra.mxu1 %v439_v35  ;;  %v435_v39 = vld [vmem:[%s2674_s2 + $0x58] sm:$0xff]  ;;  %v433_v41 = vld [vmem:[%s2674_s2 + $0x48] sm:$0xff]  ;;  %v432_v42 = vld [vmem:[%s2674_s2 + $0x40] sm:$0xff] }
   0xf   :  { %1800 = vmatprep.mubr.msk.f32.mxu0 %vm69_vm0, %v33_v8  ;;  %476 = vmatprep.subr.mxu1 %v2041_v34  ;;  %v431_v43 = vld [vmem:[%s2674_s2 + $0x38] sm:$0xff]  ;;  %v430_v44 = vld [vmem:[%s2674_s2 + $0x30] sm:$0xff]  ;;  %v429_v45 = vld [vmem:[%s2674_s2 + $0x28] sm:$0xff] }
  0x10   :  { %477 = vmatpush1.msra.mxu1 %v438_v36  ;;  %v428_v46 = vld [vmem:[%s2674_s2 + $0x20] sm:$0xff]  ;;  %v427_v47 = vld [vmem:[%s2674_s2 + $0x18] sm:$0xff]  ;;  %v426_v48 = vld [vmem:[%s2674_s2 + $0x10] sm:$0xff] }
  0x11   :  { %478 = vmatprep.subr.mxu1 %v2041_v34  ;;  %v425_v49 = vld [vmem:[%s2674_s2 + $0x8] sm:$0xff]  ;;  %v424_v50 = vld [vmem:[%s2674_s2] sm:$0xff]  ;;  %v447_v51 = vld [vmem:[%s2674_s2 + $0xb8] sm:$0xff] }
  0x12   :  { %1801 = vmatmul.mubr.msk.f32.gmra.mxu0 %vm69_vm0, %v34_v9  ;;  %479 = vmatpush1.msra.mxu1 %v437_v37  ;;  %v446_v52 = vld [vmem:[%s2674_s2 + $0xb0] sm:$0xff]  ;;  %v445_v53 = vld [vmem:[%s2674_s2 + $0xa8] sm:$0xff]  ;;  %v444_v54 = vld [vmem:[%s2674_s2 + $0xa0] sm:$0xff] }
  0x13   :  { %1803 = vmatprep.mubr.msk.f32.mxu0 %vm69_vm0, %v35_v10  ;;  %480 = vmatprep.subr.mxu1 %v2041_v34  ;;  %v443_v55 = vld [vmem:[%s2674_s2 + $0x98] sm:$0xff]  ;;  %v442_v56 = vld [vmem:[%s2674_s2 + $0x90] sm:$0xff]  ;;  %v441_v57 = vld [vmem:[%s2674_s2 + $0x88] sm:$0xff] }
  0x14   :  { %481 = vmatpush1.msra.mxu1 %v436_v38  ;;  %v2306_v58 = vld [vmem:[%s2675_s5] ss:$0 sm:$0xff] }
  0x15   :  { %482 = vmatprep.subr.mxu1 %v2041_v34  ;;  %v440_v1 = vld [vmem:[%s2674_s2 + $0x80] sm:$0xff]  ;;  %s2042_s2 = smov 64  }
  0x16   :  { %1804 = vmatmul.mubr.msk.f32.gmra.mxu0 %vm69_vm0, %v36_v11  ;;  %483 = vmatpush1.msra.mxu1 %v435_v39 }
  0x17   :  { %1806 = vmatprep.mubr.msk.f32.mxu0 %vm69_vm0, %v37_v12  ;;  %484 = vmatprep.subr.mxu1 %v2041_v34 }
  0x18   :  { %485 = vmatpush1.msra.mxu1 %v434_v40 }
  0x19   :  { %486 = vmatprep.subr.mxu1 %v2041_v34 }
  0x1a   :  { %1807 = vmatmul.mubr.msk.f32.gmra.mxu0 %vm69_vm0, %v38_v13  ;;  %487 = vmatpush1.msra.mxu1 %v433_v41 }
  0x1b   :  { %1809 = vmatprep.mubr.msk.f32.mxu0 %vm69_vm0, %v39_v14  ;;  %488 = vmatprep.subr.mxu1 %v2041_v34 }
  0x1c   :  { %489 = vmatpush1.msra.mxu1 %v432_v42 }
  0x1d   :  { %490 = vmatprep.subr.mxu1 %v2041_v34 }
  0x1e   :  { %1810 = vmatmul.mubr.msk.f32.gmra.mxu0 %vm69_vm0, %v40_v15  ;;  %491 = vmatpush1.msra.mxu1 %v431_v43 }
  0x1f   :  { %1812 = vmatprep.mubr.msk.f32.mxu0 %vm69_vm0, %v41_v16  ;;  %492 = vmatprep.subr.mxu1 %v2041_v34 }
  0x20   :  { %493 = vmatpush1.msra.mxu1 %v430_v44 }
  0x21   :  { %494 = vmatprep.subr.mxu1 %v2041_v34 }
  0x22   :  { %1813 = vmatmul.mubr.msk.f32.gmra.mxu0 %vm69_vm0, %v42_v17  ;;  %495 = vmatpush1.msra.mxu1 %v429_v45 }
  0x23   :  { %1815 = vmatprep.mubr.msk.f32.mxu0 %vm69_vm0, %v43_v18  ;;  %496 = vmatprep.subr.mxu1 %v2041_v34 }
  0x24   :  { %497 = vmatpush1.msra.mxu1 %v428_v46 }
  0x25   :  { %498 = vmatprep.subr.mxu1 %v2041_v34 }
  0x26   :  { %1816 = vmatmul.mubr.msk.f32.gmra.mxu0 %vm69_vm0, %v44_v19  ;;  %499 = vmatpush1.msra.mxu1 %v427_v47 }
  0x27   :  { %1818 = vmatprep.mubr.msk.f32.mxu0 %vm69_vm0, %v45_v20  ;;  %500 = vmatprep.subr.mxu1 %v2041_v34 }
  0x28   :  { %501 = vmatpush1.msra.mxu1 %v426_v48 }
  0x29   :  { %502 = vmatprep.subr.mxu1 %v2041_v34 }
  0x2a   :  { %1819 = vmatmul.mubr.msk.f32.gmra.mxu0 %vm69_vm0, %v46_v21  ;;  %503 = vmatpush1.msra.mxu1 %v425_v49 }
  0x2b   :  { %1821 = vmatprep.mubr.msk.f32.mxu0 %vm69_vm0, %v47_v22  ;;  %504 = vmatprep.subr.mxu1 %v2041_v34 }
  0x2c   :  { %505 = vmatpush1.msra.mxu1 %v424_v50  ;;  %v612_v50 = vld [vmem:[%s2676_s3 + $0x78] sm:$0xff] }
  0x2d   :  { %522 = vmatprep.subr.mxu1 %v2041_v34  ;;  %1839 = vmatprep.subr.mxu0 %v612_v50 }
  0x2e   :  { %1822 = vmatmul.mubr.msk.f32.gmra.mxu0 %vm69_vm0, %v48_v23  ;;  %523 = vmatpush2.msra.mxu1 %v447_v51  ;;  %v611_v51 = vld [vmem:[%s2676_s3 + $0x70] sm:$0xff] }
  0x2f   :  { %1824 = vmatprep.mubr.msk.f32.mxu0 %vm69_vm0, %v49_v24  ;;  %524 = vmatprep.subr.mxu1 %v2041_v34 }
  0x30   :  { %525 = vmatpush2.msra.mxu1 %v446_v52  ;;  %1840 = vmatpush3.msra.mxu0 %v612_v50 }
  0x31   :  { %526 = vmatprep.subr.mxu1 %v2041_v34  ;;  %1841 = vmatprep.subr.mxu0 %v611_v51 }
  0x32   :  { %1825 = vmatmul.mubr.msk.f32.gmra.mxu0 %vm69_vm0, %v50_v25  ;;  %527 = vmatpush2.msra.mxu1 %v445_v53 }
  0x33   :  { %1827 = vmatprep.mubr.msk.f32.mxu0 %vm69_vm0, %v51_v26  ;;  %528 = vmatprep.subr.mxu1 %v2041_v34 }
  0x34   :  { %529 = vmatpush2.msra.mxu1 %v444_v54  ;;  %1842 = vmatpush3.msra.mxu0 %v611_v51 }
  0x35   :  { %530 = vmatprep.subr.mxu1 %v2041_v34 }
  0x36   :  { %1828 = vmatmul.mubr.msk.f32.gmra.mxu0 %vm69_vm0, %v52_v27  ;;  %531 = vmatpush2.msra.mxu1 %v443_v55  ;;  %v610_v55 = vld [vmem:[%s2676_s3 + $0x68] sm:$0xff] }
  0x37   :  { %1830 = vmatprep.mubr.msk.f32.mxu0 %vm69_vm0, %v53_v28  ;;  %532 = vmatprep.subr.mxu1 %v2041_v34 }
  0x38   :  { %533 = vmatpush2.msra.mxu1 %v442_v56  ;;  %1843 = vmatprep.subr.mxu0 %v610_v55 }
  0x39   :  { %534 = vmatprep.subr.mxu1 %v2041_v34  ;;  %1844 = vmatpush3.msra.mxu0 %v610_v55 }
  0x3a   :  { %1831 = vmatmul.mubr.msk.f32.gmra.mxu0 %vm69_vm0, %v54_v29  ;;  %535 = vmatpush2.msra.mxu1 %v441_v57 }
  0x3b   :  { %1833 = vmatprep.mubr.msk.f32.mxu0 %vm69_vm0, %v55_v30  ;;  %536 = vmatprep.subr.mxu1 %v2041_v34 }
  0x3c   :  { %537 = vmatpush2.msra.mxu1 %v440_v1  ;;  %v608_v1 = vld [vmem:[%s2676_s3 + $0x58] sm:$0xff] }
  0x3d   :  { %1896 = vmatprep.subr.mxu1 %v2041_v34 }
  0x3e   :  { %1834 = vmatmul.mubr.msk.f32.gmra.mxu0 %vm69_vm0, %v56_v31 }
  0x3f   :  { %1836 = vmatprep.mubr.msk.f32.mxu0 %vm69_vm0, %v57_v32 }
  0x42   :  { %1837 = vmatmul.mubr.msk.f32.gmra.mxu0 %vm69_vm0, %v58_v33 }
  0xce   :  { %v1799_v59 = vpop.f32.mrf.mxu0 }
  0xcf   :  { %v2309_v60 = vadd.f32 %v1799_v59, %v2306_v58 }
  0xd0   :  { %v220_v61 = vpop.f32.mrf.mxu0 }
  0xd1   :  { %v2312_v62 = vadd.f32 %v2306_v58, %v220_v61  ;;  %v609_v61 = vld [vmem:[%s2676_s3 + $0x60] sm:$0xff] }
  0xd2   :  { %v1802_v63 = vpop.f32.mrf.mxu0  ;;  %1845 = vmatprep.subr.mxu0 %v609_v61 }
  0xd3   :  { %v2315_v0 = vadd.f32 %v1802_v63, %v2306_v58  ;;  %1846 = vmatpush3.msra.mxu0 %v609_v61 }
  0xd4   :  { %v230_v2 = vpop.f32.mrf.mxu0  ;;  %1847 = vmatprep.subr.mxu0 %v608_v1 }
  0xd5   :  { %v360_v3 = vmax.f32 %v2309_v60, %v2315_v0  ;;  %v2323_v4 = vadd.f32 %v2306_v58, %v230_v2  ;;  %1848 = vmatpush3.msra.mxu0 %v608_v1 }
  0xd6   :  { %v1805_v5 = vpop.f32.mrf.mxu0 }
  0xd7   :  { %v359_v6 = vmax.f32 %v2312_v62, %v2323_v4  ;;  %v246_v16 = vadd.f32 %v1805_v5, %v2306_v58 }
  0xd8   :  { %v240_v7 = vpop.f32.mrf.mxu0 }
  0xd9   :  { %v241_v10 = vadd.f32 %v2306_v58, %v240_v7 }
  0xda   :  { %v1808_v8 = vpop.f32.mrf.mxu0 }
  0xdb   :  { %v256_v13 = vadd.f32 %v1808_v8, %v2306_v58 }
  0xdc   :  { %v250_v9 = vpop.f32.mrf.mxu0 }
  0xdd   :  { %v251_v11 = vadd.f32 %v2306_v58, %v250_v9  ;;  %v2336_v18 = vmax.f32 %v246_v16, %v256_v13 }
  0xde   :  { %v1811_v12 = vpop.f32.mrf.mxu0 }
  0xdf   :  { %v2331_v14 = vmax.f32 %v241_v10, %v251_v11  ;;  %v266_v26 = vadd.f32 %v1811_v12, %v2306_v58 }
  0xe0   :  { %v260_v15 = vpop.f32.mrf.mxu0 }
  0xe1   :  { %383 = vrot.lane.b32.xlu0 %v2331_v14, %s2042_s2  ;;  %v261_v20 = vadd.f32 %v2306_v58, %v260_v15 }
  0xe2   :  { %v1814_v17 = vpop.f32.mrf.mxu0 }
  0xe3   :  { %v276_v23 = vadd.f32 %v1814_v17, %v2306_v58 }
  0xe4   :  { %v270_v19 = vpop.f32.mrf.mxu0 }
  0xe5   :  { %v271_v21 = vadd.f32 %v2306_v58, %v270_v19  ;;  %385 = vrot.lane.b32.xlu0 %v2336_v18, %s2042_s2  ;;  %v2350_v28 = vmax.f32 %v266_v26, %v276_v23 }
  0xe6   :  { %v1817_v22 = vpop.f32.mrf.mxu0 }
  0xe7   :  { %v2343_v24 = vmax.f32 %v261_v20, %v271_v21  ;;  %v286_v31 = vadd.f32 %v1817_v22, %v2306_v58 }
  0xe8   :  { %v280_v25 = vpop.f32.mrf.mxu0 }
  0xe9   :  { %387 = vrot.lane.b32.xlu1 %v2343_v24, %s2042_s2  ;;  %1666 = vmatprep.mubr.msk.f32.mxu1 %vm413_vm1, %v2343_v24  ;;  %v281_v32 = vadd.f32 %v2306_v58, %v280_v25 }
  0xea   :  { %v1820_v27 = vpop.f32.mrf.mxu0 }
  0xeb   :  { %v296_v29 = vadd.f32 %v1820_v27, %v2306_v58 }
  0xec   :  { %v290_v30 = vpop.f32.mrf.mxu0 }
  0xed   :  { %v291_v33 = vadd.f32 %v2306_v58, %v290_v30  ;;  %389 = vrot.lane.b32.xlu1 %v2350_v28, %s2042_s2  ;;  %v2358_v36 = vmax.f32 %v286_v31, %v296_v29  ;;  %v606_v29 = vld [vmem:[%s2676_s3 + $0x48] sm:$0xff]  ;;  %v605_v30 = vld [vmem:[%s2676_s3 + $0x40] sm:$0xff]  ;;  %v604_v31 = vld [vmem:[%s2676_s3 + $0x38] sm:$0xff] }
  0xee   :  { %v1823_v35 = vpop.f32.mrf.mxu0 }
  0xef   :  { %v2360_v37 = vmax.f32 %v281_v32, %v291_v33  ;;  %v306_v40 = vadd.f32 %v1823_v35, %v2306_v58  ;;  %v603_v32 = vld [vmem:[%s2676_s3 + $0x30] sm:$0xff]  ;;  %v602_v33 = vld [vmem:[%s2676_s3 + $0x28] sm:$0xff]  ;;  %v601_v35 = vld [vmem:[%s2676_s3 + $0x20] sm:$0xff] }
  0xf0   :  { %v300_v38 = vpop.f32.mrf.mxu0 }
  0xf1   :  { %393 = vrot.lane.b32.xlu1 %v2358_v36, %s2042_s2  ;;  %391 = vrot.lane.b32.xlu0 %v2360_v37, %s2042_s2  ;;  %v301_v43 = vadd.f32 %v2306_v58, %v300_v38  ;;  %v598_v38 = vld [vmem:[%s2676_s3 + $0x8] sm:$0xff] }
  0xf2   :  { %v1826_v39 = vpop.f32.mrf.mxu0 }
  0xf3   :  { %v316_v41 = vadd.f32 %v1826_v39, %v2306_v58  ;;  %v597_v39 = vld [vmem:[%s2676_s3] sm:$0xff] }
  0xf4   :  { %v310_v42 = vpop.f32.mrf.mxu0 }
  0xf5   :  { %v2369_v44 = vmax.f32 %v306_v40, %v316_v41  ;;  %v311_v45 = vadd.f32 %v2306_v58, %v310_v42  ;;  %v2478_v40 = vld [vmem:[%s2677_s4 + $0x18] sm:$0xff]  ;;  %v2485_v41 = vld [vmem:[%s2677_s4 + $0x10] sm:$0xff]  ;;  %v2491_v42 = vld [vmem:[%s2677_s4 + $0x8] sm:$0xff] }
  0xf6   :  { %v1829_v46 = vpop.f32.mrf.mxu0 }
  0xf7   :  { %v2372_v47 = vmax.f32 %v301_v43, %v311_v45  ;;  %397 = vrot.lane.b32.xlu1 %v2369_v44, %s2042_s2  ;;  %v326_v52 = vadd.f32 %v1829_v46, %v2306_v58  ;;  %v2498_v43 = vld [vmem:[%s2677_s4] sm:$0xff] }
  0xf8   :  { %v320_v48 = vpop.f32.mrf.mxu0 }
  0xf9   :  { %395 = vrot.lane.b32.xlu0 %v2372_v47, %s2042_s2  ;;  %v321_v56 = vadd.f32 %v2306_v58, %v320_v48 }
  0xfa   :  { %v1832_v49 = vpop.f32.mrf.mxu0 }
  0xfb   :  { %v336_v53 = vadd.f32 %v1832_v49, %v2306_v58 }
  0xfc   :  { %v330_v54 = vpop.f32.mrf.mxu0 }
  0xfd   :  { %v370_v57 = vmax.f32 %v326_v52, %v336_v53  ;;  %v331_v59 = vadd.f32 %v2306_v58, %v330_v54 }
  0xfe   :  { %v1835_v4 = vpop.f32.mrf.mxu0 }
  0xff   :  { %v369_v63 = vmax.f32 %v321_v56, %v331_v59  ;;  %401 = vrot.lane.b32.xlu1 %v370_v57, %s2042_s2  ;;  %v346_v20 = vadd.f32 %v1835_v4, %v2306_v58  ;;  %v1665_v56 = vld [vmem:[%s2675_s5 + $0x1] ss:$0 sm:$0xff] }
 0x100   :  { %v340_v60 = vpop.f32.mrf.mxu0 }
 0x101   :  { %399 = vrot.lane.b32.xlu0 %v369_v63, %s2042_s2  ;;  %v341_v16 = vadd.f32 %v2306_v58, %v340_v60 }
 0x102   :  { %v1838_v12 = vpop.f32.mrf.mxu0 }
 0x103   :  { %v356_v21 = vadd.f32 %v1838_v12, %v2306_v58 }
 0x105   :  { %v372_v25 = vmax.f32 %v346_v20, %v356_v21  ;;  %v1676_v20 = vld [vmem:[%s2675_s5 + $0x2] ss:$0 sm:$0xff] }
 0x153   :  { %v384_v2 = vpop.permute.xlu0 %383 }
 0x154   :  { %v414_v5 = vsel %vm413_vm1, %v359_v6, %v384_v2 }
 0x155   :  { %539 = vmatmul.mubr.f32.vlgmr.msra.gmra.mxu1 %v414_v5 }
 0x156   :  { %1667 = vmatprep.mubr.msk.f32.mxu1 %vm413_vm1, %v2350_v28  ;;  %1897 = vmatpush3.msra.mxu1 %v2478_v40 }
 0x157   :  { %v386_v7 = vpop.permute.xlu0 %385  ;;  %1898 = vmatprep.subr.mxu1 %v2041_v34 }
 0x158   :  { %v415_v8 = vsel %vm413_vm1, %v360_v3, %v386_v7  ;;  %1899 = vmatpush3.msra.mxu1 %v2485_v41 }
 0x159   :  { %544 = vmatmul.mubr.f32.gmra.mxu1 %v415_v8  ;;  %1900 = vmatprep.subr.mxu1 %v2041_v34 }
 0x15a   :  { %1668 = vmatprep.mubr.msk.f32.mxu1 %vm413_vm1, %v2360_v37  ;;  %1901 = vmatpush3.msra.mxu1 %v2491_v42 }
 0x15b   :  { %v388_v9 = vpop.permute.xlu1 %387  ;;  %1902 = vmatprep.subr.mxu1 %v2041_v34 }
 0x15c   :  { %v416_v62 = vsel %vm413_vm1, %v2331_v14, %v388_v9  ;;  %v350_v14 = vpop.f32.mrf.mxu0  ;;  %1903 = vmatpush3.msra.mxu1 %v2498_v43 }
 0x15d   :  { %549 = vmatmul.mubr.f32.gmra.mxu1 %v416_v62  ;;  %v351_v17 = vadd.f32 %v2306_v58, %v350_v14  ;;  %v607_v58 = vld [vmem:[%s2676_s3 + $0x50] sm:$0xff]  ;;  %1918 = vmatprep.subr.mxu1 %v2041_v34 }
 0x15e   :  { %1669 = vmatprep.mubr.msk.f32.mxu1 %vm413_vm1, %v2358_v36  ;;  %1849 = vmatprep.subr.mxu0 %v607_v58 }
 0x15f   :  { %v390_v6 = vpop.permute.xlu1 %389  ;;  %v371_v22 = vmax.f32 %v341_v16, %v351_v17  ;;  %1850 = vmatpush3.msra.mxu0 %v607_v58 }
 0x160   :  { %v417_v10 = vsel %vm413_vm1, %v2336_v18, %v390_v6  ;;  %1851 = vmatprep.subr.mxu0 %v606_v29 }
 0x161   :  { %554 = vmatmul.mubr.f32.gmra.mxu1 %v417_v10  ;;  %1852 = vmatpush3.msra.mxu0 %v606_v29 }
 0x162   :  { %1670 = vmatprep.mubr.msk.f32.mxu1 %vm413_vm1, %v2372_v47  ;;  %1853 = vmatprep.subr.mxu0 %v605_v30 }
 0x163   :  { %v392_v0 = vpop.permute.xlu0 %391  ;;  %v394_v11 = vpop.permute.xlu1 %393  ;;  %1854 = vmatpush3.msra.mxu0 %v605_v30 }
 0x164   :  { %v418_v3 = vsel %vm413_vm1, %v2343_v24, %v392_v0  ;;  %v419_v13 = vsel %vm413_vm1, %v2350_v28, %v394_v11  ;;  %1855 = vmatprep.subr.mxu0 %v604_v31 }
 0x165   :  { %559 = vmatmul.mubr.f32.gmra.mxu1 %v418_v3  ;;  %1856 = vmatpush3.msra.mxu0 %v604_v31 }
 0x166   :  { %1671 = vmatprep.mubr.msk.f32.mxu1 %vm413_vm1, %v2369_v44  ;;  %1857 = vmatprep.subr.mxu0 %v603_v32 }
 0x167   :  { %1858 = vmatpush3.msra.mxu0 %v603_v32 }
 0x168   :  { %1859 = vmatprep.subr.mxu0 %v602_v33 }
 0x169   :  { %564 = vmatmul.mubr.f32.gmra.mxu1 %v419_v13  ;;  %v398_v19 = vpop.permute.xlu1 %397  ;;  %1860 = vmatpush3.msra.mxu0 %v602_v33 }
 0x16a   :  { %1672 = vmatprep.mubr.msk.f32.mxu1 %vm413_vm1, %v369_v63  ;;  %v421_v23 = vsel %vm413_vm1, %v2358_v36, %v398_v19  ;;  %1861 = vmatprep.subr.mxu0 %v601_v35  ;;  %v600_v36 = vld [vmem:[%s2676_s3 + $0x18] sm:$0xff] }
 0x16b   :  { %v396_v15 = vpop.permute.xlu0 %395  ;;  %1862 = vmatpush3.msra.mxu0 %v601_v35 }
 0x16c   :  { %v420_v18 = vsel %vm413_vm1, %v2360_v37, %v396_v15  ;;  %1863 = vmatprep.subr.mxu0 %v600_v36  ;;  %v599_v37 = vld [vmem:[%s2676_s3 + $0x10] sm:$0xff] }
 0x16d   :  { %569 = vmatmul.mubr.f32.gmra.mxu1 %v420_v18  ;;  %1864 = vmatpush3.msra.mxu0 %v600_v36 }
 0x16e   :  { %1673 = vmatprep.mubr.msk.f32.mxu1 %vm413_vm1, %v370_v57  ;;  %1865 = vmatprep.subr.mxu0 %v599_v37 }
 0x16f   :  { %1866 = vmatpush3.msra.mxu0 %v599_v37 }
 0x170   :  { %1867 = vmatprep.subr.mxu0 %v598_v38 }
 0x171   :  { %574 = vmatmul.mubr.f32.gmra.mxu1 %v421_v23  ;;  %v402_v27 = vpop.permute.xlu1 %401  ;;  %1868 = vmatpush3.msra.mxu0 %v598_v38 }
 0x172   :  { %1674 = vmatprep.mubr.msk.f32.mxu1 %vm413_vm1, %v371_v22  ;;  %v423_v28 = vsel %vm413_vm1, %v2369_v44, %v402_v27  ;;  %1869 = vmatprep.subr.mxu0 %v597_v39 }
 0x173   :  { %v400_v24 = vpop.permute.xlu0 %399  ;;  %1870 = vmatpush3.msra.mxu0 %v597_v39 }
 0x174   :  { %v422_v26 = vsel %vm413_vm1, %v2372_v47, %v400_v24  ;;  %1874 = vmatprep.subr.mxu0 %v2041_v34 }
 0x175   :  { %579 = vmatmul.mubr.f32.gmra.mxu1 %v422_v26 }
 0x176   :  { %1675 = vmatprep.mubr.msk.f32.mxu1 %vm413_vm1, %v372_v25 }
 0x179   :  { %584 = vmatmul.mubr.f32.gmra.mxu1 %v423_v28 }
 0x17a   :  { %1904 = vmatprep.mubr.msk.f32.mxu1 %vm2043_vm2, %v2041_v34 }
 0x215   :  { %v540_v44 = vpop.f32.mrf.mxu1 }
 0x216   :  { %v541_v63 = vadd.f32 %v1665_v56, %v540_v44 }
 0x217   :  { %v542_v45 = vpop.f32.mrf.mxu1 }
 0x219   :  { %v545_v46 = vpop.f32.mrf.mxu1 }
 0x21a   :  { %v546_v62 = vadd.f32 %v1665_v56, %v545_v46 }
 0x21b   :  { %v547_v47 = vpop.f32.mrf.mxu1 }
 0x21d   :  { %v550_v48 = vpop.f32.mrf.mxu1 }
 0x21e   :  { %v551_v59 = vadd.f32 %v1665_v56, %v550_v48 }
 0x21f   :  { %v552_v49 = vpop.f32.mrf.mxu1 }
 0x220   :  { %v589_v5 = vmax.f32 %v541_v63, %v551_v59 }
 0x221   :  { %v555_v50 = vpop.f32.mrf.mxu1 }
 0x222   :  { %v556_v7 = vadd.f32 %v1665_v56, %v555_v50 }
 0x223   :  { %v557_v51 = vpop.f32.mrf.mxu1 }
 0x224   :  { %v590_v60 = vmax.f32 %v546_v62, %v556_v7 }
 0x225   :  { %v560_v52 = vpop.f32.mrf.mxu1 }
 0x226   :  { %v561_v1 = vadd.f32 %v1665_v56, %v560_v52 }
 0x227   :  { %v562_v53 = vpop.f32.mrf.mxu1 }
 0x228   :  { %v591_v4 = vmax.f32 %v589_v5, %v561_v1 }
 0x229   :  { %v565_v54 = vpop.f32.mrf.mxu1 }
 0x22a   :  { %v566_v6 = vadd.f32 %v1665_v56, %v565_v54 }
 0x22b   :  { %v567_v55 = vpop.f32.mrf.mxu1 }
 0x22c   :  { %v592_v13 = vmax.f32 %v590_v60, %v566_v6 }
 0x22d   :  { %v570_v57 = vpop.f32.mrf.mxu1 }
 0x22e   :  { %v571_v8 = vadd.f32 %v1665_v56, %v570_v57 }
 0x22f   :  { %v572_v61 = vpop.f32.mrf.mxu1 }
 0x230   :  { %v593_v0 = vmax.f32 %v591_v4, %v571_v8 }
 0x231   :  { %v575_v2 = vpop.f32.mrf.mxu1 }
 0x232   :  { %v576_v3 = vadd.f32 %v1665_v56, %v575_v2 }
 0x233   :  { %v577_v9 = vpop.f32.mrf.mxu1 }
 0x234   :  { %v594_v16 = vmax.f32 %v592_v13, %v576_v3 }
 0x235   :  { %v580_v10 = vpop.f32.mrf.mxu1 }
 0x236   :  { %v581_v11 = vadd.f32 %v1665_v56, %v580_v10 }
 0x237   :  { %v582_v12 = vpop.f32.mrf.mxu1 }
 0x238   :  { %v595_v14 = vmax.f32 %v593_v0, %v581_v11 }
 0x239   :  { %v585_v15 = vpop.f32.mrf.mxu1 }
 0x23a   :  { %v586_v17 = vadd.f32 %v1665_v56, %v585_v15  ;;  %1871 = vmatprep.mubr.f32.mxu0 %v595_v14 }
 0x23b   :  { %v587_v18 = vpop.f32.mrf.mxu1 }
 0x23c   :  { %v596_v19 = vmax.f32 %v594_v16, %v586_v17 }
 0x23e   :  { %1872 = vmatmul.mubr.f32.vlgmr.msra.gmra.mxu0 %v596_v19 }
 0x23f   :  { %1875 = vmatpush3.msra.mxu0 %v2478_v40  ;;  %1882 = vmatprep.mubr.msk.f32.mxu0 %vm2043_vm2, %v2041_v34 }
 0x240   :  { %1876 = vmatprep.subr.mxu0 %v2041_v34 }
 0x241   :  { %1877 = vmatpush3.msra.mxu0 %v2485_v41 }
 0x242   :  { %1878 = vmatprep.subr.mxu0 %v2041_v34 }
 0x243   :  { %1879 = vmatpush3.msra.mxu0 %v2491_v42 }
 0x244   :  { %1880 = vmatprep.subr.mxu0 %v2041_v34 }
 0x245   :  { %1881 = vmatpush3.msra.mxu0 %v2498_v43 }
 0x246   :  { %1883 = vmatmul.mubr.f32.vlgmr.msra.gmra.mxu0 %v2041_v34  ;;  %1885 = vmatprep.subr.mxu0 %v2041_v34 }
 0x247   :  { %1886 = vmatpush3.msra.mxu0 %v2478_v40  ;;  %1893 = vmatprep.mubr.msk.f32.mxu0 %vm2043_vm2, %v2041_v34 }
 0x248   :  { %1887 = vmatprep.subr.mxu0 %v2041_v34 }
 0x249   :  { %1888 = vmatpush3.msra.mxu0 %v2485_v41 }
 0x24a   :  { %1889 = vmatprep.subr.mxu0 %v2041_v34 }
 0x24b   :  { %1890 = vmatpush3.msra.mxu0 %v2491_v42 }
 0x24c   :  { %1891 = vmatprep.subr.mxu0 %v2041_v34 }
 0x24d   :  { %1892 = vmatpush3.msra.mxu0 %v2498_v43 }
 0x24e   :  { %1907 = vmatprep.subr.mxu0 %v2041_v34 }
 0x2fe   :  { %v1873_v21 = vpop.f32.mrf.mxu0 }
 0x2ff   :  { %v2532_v22 = vadd.f32 %v1873_v21, %v1676_v20 }
 0x300   :  { %v683_v23 = vpop.f32.mrf.mxu0 }
 0x301   :  { %v2534_v24 = vadd.f32 %v1676_v20, %v683_v23 }
 0x306   :  { %v766_v25 = vpop.f32.mrf.mxu0 }
 0x307   :  { %v770_v26 = vadd.f32 %v766_v25, %v2534_v24 }
 0x308   :  { %v1884_v27 = vpop.f32.mrf.mxu0 }
 0x309   :  { %1977 = vtanh.f32 %v770_v26  ;;  %v771_v58 = vsub.f32 0.0, %v770_v26 }
 0x30b   :  { %v772_v29 = vmul.f32 1.442695, %v771_v58 }
 0x30d   :  { %1979 = vpow2.f32 %v772_v29 }
 0x316   :  { %v1978_v28 = vpop.eup %1977 }
 0x317   :  { %779 = vrot.lane.b32.xlu0 %v1978_v28, %s2044_s27 }
 0x31a   :  { %v1980_v30 = vpop.eup %1979 }
 0x31b   :  { %v774_v31 = vadd.f32 1.0, %v1980_v30 }
 0x31d   :  { %1981 = vrcp.f32 %v774_v31 }
 0x32a   :  { %v1982_v32 = vpop.eup %1981 }
 0x32b   :  { %v777_v36 = vmul.f32 0.0, %v1982_v32 }
 0x389   :  { %v780_v33 = vpop.permute.xlu0 %779 }
 0x38a   :  { %v782_v35 = vmul.f32 %v1982_v32, %v780_v33 }
 0x38c   :  { %784 = vrot.lane.b32.xlu1 %v782_v35, %s2044_s27 }
 0x3fe   :  { %v785_v37 = vpop.permute.xlu1 %784 }
 0x3ff   :  { %v787_v38 = vadd.f32 %v785_v37, %v777_v36 }
 0x401   :  { %1983 = vtanh.f32 %v787_v38  ;;  %v880_v61 = vrot.slane %v787_v38, 6 }
 0x40e   :  { %v1984_v39 = vpop.eup %1983 }
 0x40f   :  { %790 = vrot.lane.b32.xlu0 %v1984_v39, %s2044_s27 }
 0x481   :  { %v791_v44 = vpop.permute.xlu0 %790 }
 0x482   :  { %v2540_v45 = vmul.f32 %v1982_v32, %v791_v44 }
 0x484   :  { %795 = vrot.lane.b32.xlu1 %v2540_v45, %s2042_s2 }
 0x4f6   :  { %v796_v46 = vpop.permute.xlu1 %795 }
 0x4f7   :  { %1894 = vmatmul.mubr.msk.f32.vlgmr.msra.gmra.mxu0 %vm696_vm3, %v796_v46 }
 0x4f8   :  { %1908 = vmatpush3.msra.mxu0 %v2478_v40  ;;  %1915 = vmatprep.mubr.msk.f32.mxu0 %vm2043_vm2, %v2041_v34 }
 0x4f9   :  { %1909 = vmatprep.subr.mxu0 %v2041_v34 }
 0x4fa   :  { %1910 = vmatpush3.msra.mxu0 %v2485_v41 }
 0x4fb   :  { %1911 = vmatprep.subr.mxu0 %v2041_v34 }
 0x4fc   :  { %1912 = vmatpush3.msra.mxu0 %v2491_v42 }
 0x4fd   :  { %1913 = vmatprep.subr.mxu0 %v2041_v34 }
 0x4fe   :  { %1914 = vmatpush3.msra.mxu0 %v2498_v43 }
 0x4ff   :  { %1929 = vmatprep.subr.mxu0 %v2041_v34 }
 0x5b7   :  { %v865_v47 = vpop.f32.mrf.mxu0 }
 0x5b8   :  { %v870_v48 = vrot.slane %v865_v47, 6 }
 0x5b9   :  { %v1895_v49 = vpop.f32.mrf.mxu0 }
 0x5ba   :  { %v872_v50 = vadd.f32 %v870_v48, %v2534_v24 }
 0x5bc   :  { %1985 = vtanh.f32 %v872_v50  ;;  %v873_v52 = vsub.f32 0.0, %v872_v50 }
 0x5be   :  { %v874_v53 = vmul.f32 1.442695, %v873_v52 }
 0x5c0   :  { %1987 = vpow2.f32 %v874_v53 }
 0x5c9   :  { %v1986_v51 = vpop.eup %1985 }
 0x5ca   :  { %884 = vrot.lane.b32.xlu0 %v1986_v51, %s2044_s27 }
 0x5cd   :  { %v1988_v54 = vpop.eup %1987 }
 0x5ce   :  { %v876_v55 = vadd.f32 1.0, %v1988_v54 }
 0x5d0   :  { %1989 = vrcp.f32 %v876_v55 }
 0x5dd   :  { %v1990_v56 = vpop.eup %1989 }
 0x5de   :  { %v882_v63 = vmul.f32 %v1990_v56, %v880_v61 }
 0x63c   :  { %v885_v57 = vpop.permute.xlu0 %884 }
 0x63d   :  { %v887_v59 = vmul.f32 %v1990_v56, %v885_v57 }
 0x63f   :  { %889 = vrot.lane.b32.xlu1 %v887_v59, %s2044_s27 }
 0x6b1   :  { %v890_v1 = vpop.permute.xlu1 %889 }
 0x6b2   :  { %v892_v2 = vadd.f32 %v890_v1, %v882_v63 }
 0x6b4   :  { %1991 = vtanh.f32 %v892_v2  ;;  %v986_v17 = vrot.slane %v892_v2, 6 }
 0x6c1   :  { %v1992_v5 = vpop.eup %1991 }
 0x6c2   :  { %895 = vrot.lane.b32.xlu0 %v1992_v5, %s2044_s27 }
 0x734   :  { %v896_v7 = vpop.permute.xlu0 %895 }
 0x735   :  { %v898_v8 = vmul.f32 %v1990_v56, %v896_v7 }
 0x737   :  { %v900_v9 = vrot.slane %v898_v8, 2  ;;  %v1532_v26 = vsel %vm1531_vm4, %v2540_v45, %v898_v8 }
 0x739   :  { %901 = vrot.lane.b32.xlu1 %v900_v9, %s2042_s2 }
 0x7ab   :  { %v902_v62 = vpop.permute.xlu1 %901 }
 0x7ac   :  { %1905 = vmatmul.mubr.msk.f32.vlgmr.msra.gmra.mxu1 %vm696_vm3, %v902_v62 }
 0x7ad   :  { %1919 = vmatpush3.msra.mxu1 %v2478_v40  ;;  %1926 = vmatprep.mubr.msk.f32.mxu1 %vm2043_vm2, %v2041_v34 }
 0x7ae   :  { %1920 = vmatprep.subr.mxu1 %v2041_v34 }
 0x7af   :  { %1921 = vmatpush3.msra.mxu1 %v2485_v41 }
 0x7b0   :  { %1922 = vmatprep.subr.mxu1 %v2041_v34 }
 0x7b1   :  { %1923 = vmatpush3.msra.mxu1 %v2491_v42 }
 0x7b2   :  { %1924 = vmatprep.subr.mxu1 %v2041_v34 }
 0x7b3   :  { %1925 = vmatpush3.msra.mxu1 %v2498_v43 }
 0x7b4   :  { %1940 = vmatprep.subr.mxu1 %v2041_v34 }
 0x86c   :  { %v971_v4 = vpop.f32.mrf.mxu1 }
 0x86d   :  { %v976_v6 = vrot.slane %v971_v4, 4 }
 0x86e   :  { %v1906_v10 = vpop.f32.mrf.mxu1 }
 0x86f   :  { %v978_v60 = vadd.f32 %v976_v6, %v2534_v24 }
 0x871   :  { %1993 = vtanh.f32 %v978_v60  ;;  %v979_v3 = vsub.f32 0.0, %v978_v60 }
 0x873   :  { %v980_v11 = vmul.f32 1.442695, %v979_v3 }
 0x875   :  { %1995 = vpow2.f32 %v980_v11 }
 0x87e   :  { %v1994_v0 = vpop.eup %1993 }
 0x87f   :  { %990 = vrot.lane.b32.xlu0 %v1994_v0, %s2044_s27 }
 0x882   :  { %v1996_v12 = vpop.eup %1995 }
 0x883   :  { %v982_v13 = vadd.f32 1.0, %v1996_v12 }
 0x885   :  { %1997 = vrcp.f32 %v982_v13 }
 0x892   :  { %v1998_v14 = vpop.eup %1997 }
 0x893   :  { %v988_v18 = vmul.f32 %v1998_v14, %v986_v17 }
 0x8f1   :  { %v991_v15 = vpop.permute.xlu0 %990 }
 0x8f2   :  { %v993_v16 = vmul.f32 %v1998_v14, %v991_v15 }
 0x8f4   :  { %995 = vrot.lane.b32.xlu1 %v993_v16, %s2044_s27 }
 0x966   :  { %v996_v19 = vpop.permute.xlu1 %995 }
 0x967   :  { %v998_v20 = vadd.f32 %v996_v19, %v988_v18 }
 0x969   :  { %1999 = vtanh.f32 %v998_v20  ;;  %v1092_v46 = vrot.slane %v998_v20, 6 }
 0x976   :  { %v2000_v21 = vpop.eup %1999 }
 0x977   :  { %1001 = vrot.lane.b32.xlu0 %v2000_v21, %s2044_s27 }
 0x9e9   :  { %v1002_v23 = vpop.permute.xlu0 %1001 }
 0x9ea   :  { %v1004_v25 = vmul.f32 %v1998_v14, %v1002_v23 }
 0x9ec   :  { %v1006_v27 = vrot.slane %v1004_v25, 4  ;;  %v1534_v28 = vsel %vm1533_vm5, %v1532_v26, %v1004_v25 }
 0x9ee   :  { %1007 = vrot.lane.b32.xlu1 %v1006_v27, %s2042_s2 }
 0xa60   :  { %v1008_v58 = vpop.permute.xlu1 %1007 }
 0xa61   :  { %1916 = vmatmul.mubr.msk.f32.vlgmr.msra.gmra.mxu0 %vm696_vm3, %v1008_v58 }
 0xa62   :  { %1930 = vmatpush3.msra.mxu0 %v2478_v40  ;;  %1937 = vmatprep.mubr.msk.f32.mxu0 %vm2043_vm2, %v2041_v34 }
 0xa63   :  { %1931 = vmatprep.subr.mxu0 %v2041_v34 }
 0xa64   :  { %1932 = vmatpush3.msra.mxu0 %v2485_v41 }
 0xa65   :  { %1933 = vmatprep.subr.mxu0 %v2041_v34 }
 0xa66   :  { %1934 = vmatpush3.msra.mxu0 %v2491_v42 }
 0xa67   :  { %1935 = vmatprep.subr.mxu0 %v2041_v34 }
 0xa68   :  { %1936 = vmatpush3.msra.mxu0 %v2498_v43 }
 0xa69   :  { %1951 = vmatprep.subr.mxu0 %v2041_v34 }
 0xb21   :  { %v1077_v29 = vpop.f32.mrf.mxu0 }
 0xb22   :  { %v1082_v30 = vrot.slane %v1077_v29, 2 }
 0xb23   :  { %v1917_v31 = vpop.f32.mrf.mxu0 }
 0xb24   :  { %v1084_v32 = vadd.f32 %v1082_v30, %v2534_v24 }
 0xb26   :  { %2001 = vtanh.f32 %v1084_v32  ;;  %v1085_v35 = vsub.f32 0.0, %v1084_v32 }
 0xb28   :  { %v1086_v36 = vmul.f32 1.442695, %v1085_v35 }
 0xb2a   :  { %2003 = vpow2.f32 %v1086_v36 }
 0xb33   :  { %v2002_v33 = vpop.eup %2001 }
 0xb34   :  { %1096 = vrot.lane.b32.xlu0 %v2002_v33, %s2044_s27 }
 0xb37   :  { %v2004_v37 = vpop.eup %2003 }
 0xb38   :  { %v1088_v38 = vadd.f32 1.0, %v2004_v37 }
 0xb3a   :  { %2005 = vrcp.f32 %v1088_v38 }
 0xb47   :  { %v2006_v39 = vpop.eup %2005 }
 0xb48   :  { %v1094_v47 = vmul.f32 %v2006_v39, %v1092_v46 }
 0xba6   :  { %v1097_v44 = vpop.permute.xlu0 %1096 }
 0xba7   :  { %v1099_v45 = vmul.f32 %v2006_v39, %v1097_v44 }
 0xba9   :  { %1101 = vrot.lane.b32.xlu1 %v1099_v45, %s2044_s27 }
 0xc1b   :  { %v1102_v48 = vpop.permute.xlu1 %1101 }
 0xc1c   :  { %v1104_v49 = vadd.f32 %v1102_v48, %v1094_v47 }
 0xc1e   :  { %2007 = vtanh.f32 %v1104_v49  ;;  %v1195_v9 = vrot.slane %v1104_v49, 6 }
 0xc2b   :  { %v2008_v24 = vpop.eup %2007 }
 0xc2c   :  { %1107 = vrot.lane.b32.xlu0 %v2008_v24, %s2044_s27 }
 0xc9e   :  { %v1108_v50 = vpop.permute.xlu0 %1107 }
 0xc9f   :  { %v1110_v51 = vmul.f32 %v2006_v39, %v1108_v50 }
 0xca1   :  { %v1112_v52 = vrot.slane %v1110_v51, 6  ;;  %v2595_v53 = vsel %vm1535_vm6, %v1534_v28, %v1110_v51 }
 0xca3   :  { %1113 = vrot.lane.b32.xlu1 %v1112_v52, %s2042_s2 }
 0xd15   :  { %v1114_v54 = vpop.permute.xlu1 %1113 }
 0xd16   :  { %1927 = vmatmul.mubr.msk.f32.vlgmr.msra.gmra.mxu1 %vm696_vm3, %v1114_v54 }
 0xd17   :  { %1941 = vmatpush3.msra.mxu1 %v2478_v40  ;;  %1948 = vmatprep.mubr.msk.f32.mxu1 %vm2043_vm2, %v2041_v34 }
 0xd18   :  { %1942 = vmatprep.subr.mxu1 %v2041_v34 }
 0xd19   :  { %1943 = vmatpush3.msra.mxu1 %v2485_v41 }
 0xd1a   :  { %1944 = vmatprep.subr.mxu1 %v2041_v34 }
 0xd1b   :  { %1945 = vmatpush3.msra.mxu1 %v2491_v42 }
 0xd1c   :  { %1946 = vmatprep.subr.mxu1 %v2041_v34 }
 0xd1d   :  { %1947 = vmatpush3.msra.mxu1 %v2498_v43 }
 0xdd6   :  { %v1183_v55 = vpop.f32.mrf.mxu1 }
 0xdd7   :  { %v1187_v56 = vadd.f32 %v1183_v55, %v2532_v22 }
 0xdd8   :  { %v1928_v57 = vpop.f32.mrf.mxu1 }
 0xdd9   :  { %2009 = vtanh.f32 %v1187_v56  ;;  %v1188_v61 = vsub.f32 0.0, %v1187_v56 }
 0xddb   :  { %v1189_v63 = vmul.f32 1.442695, %v1188_v61 }
 0xddd   :  { %2011 = vpow2.f32 %v1189_v63 }
 0xde6   :  { %v2010_v59 = vpop.eup %2009 }
 0xde7   :  { %1199 = vrot.lane.b32.xlu0 %v2010_v59, %s2044_s27 }
 0xdea   :  { %v2012_v1 = vpop.eup %2011 }
 0xdeb   :  { %v1191_v2 = vadd.f32 1.0, %v2012_v1 }
 0xded   :  { %2013 = vrcp.f32 %v1191_v2 }
 0xdfa   :  { %v2014_v5 = vpop.eup %2013 }
 0xdfb   :  { %v1197_v62 = vmul.f32 %v2014_v5, %v1195_v9 }
 0xe59   :  { %v1200_v7 = vpop.permute.xlu0 %1199 }
 0xe5a   :  { %v1202_v8 = vmul.f32 %v2014_v5, %v1200_v7 }
 0xe5c   :  { %1204 = vrot.lane.b32.xlu1 %v1202_v8, %s2044_s27 }
 0xece   :  { %v1205_v4 = vpop.permute.xlu1 %1204 }
 0xecf   :  { %v1207_v6 = vadd.f32 %v1205_v4, %v1197_v62 }
 0xed1   :  { %2015 = vtanh.f32 %v1207_v6 }
 0xede   :  { %v2016_v10 = vpop.eup %2015 }
 0xedf   :  { %1210 = vrot.lane.b32.xlu0 %v2016_v10, %s2044_s27 }
 0xf51   :  { %v1211_v60 = vpop.permute.xlu0 %1210 }
 0xf52   :  { %v2612_v0 = vmul.f32 %v2014_v5, %v1211_v60 }
 0xf54   :  { %1215 = vrot.lane.b32.xlu1 %v2612_v0, %s2042_s2 }
 0xfc6   :  { %v1216_v3 = vpop.permute.xlu1 %1215 }
 0xfc7   :  { %1938 = vmatmul.mubr.msk.f32.vlgmr.msra.gmra.mxu0 %vm696_vm3, %v1216_v3  ;;  %v28_v3 = vld [vmem:[%s2675_s5 + $0x13] sm:$0xff] }
 0xfc8   :  { %1952 = vmatpush3.msra.mxu0 %v2478_v40  ;;  %1959 = vmatprep.mubr.msk.f32.mxu0 %vm2043_vm2, %v2041_v34 }
 0xfc9   :  { %1953 = vmatprep.subr.mxu0 %v2041_v34 }
 0xfca   :  { %1954 = vmatpush3.msra.mxu0 %v2485_v41 }
 0xfcb   :  { %1955 = vmatprep.subr.mxu0 %v2041_v34 }
 0xfcc   :  { %1956 = vmatpush3.msra.mxu0 %v2491_v42 }
 0xfcd   :  { %1957 = vmatprep.subr.mxu0 %v2041_v34 }
 0xfce   :  { %1958 = vmatpush3.msra.mxu0 %v2498_v43  ;;  %v1300_v43 = vrot.slane %v1207_v6, 6 }
0x1087   :  { %v1285_v11 = vpop.f32.mrf.mxu0 }
0x1088   :  { %v1290_v12 = vrot.slane %v1285_v11, 6  ;;  %v26_v11 = vld [vmem:[%s2675_s5 + $0x3] sm:$0xff] }
0x1089   :  { %v1939_v13 = vpop.f32.mrf.mxu0 }
0x108a   :  { %v1292_v40 = vadd.f32 %v1290_v12, %v2532_v22 }
0x108c   :  { %2017 = vtanh.f32 %v1292_v40  ;;  %v1293_v15 = vsub.f32 0.0, %v1292_v40 }
0x108e   :  { %v1294_v16 = vmul.f32 1.442695, %v1293_v15 }
0x1090   :  { %2019 = vpow2.f32 %v1294_v16  ;;  %v1684_v16 = vld [vmem:[%s2675_s5 + $0x23] ss:$0 sm:$0xff] }
0x1099   :  { %v2018_v14 = vpop.eup %2017 }
0x109a   :  { %1304 = vrot.lane.b32.xlu0 %v2018_v14, %s2044_s27 }
0x109d   :  { %v2020_v41 = vpop.eup %2019 }
0x109e   :  { %v1296_v17 = vadd.f32 1.0, %v2020_v41 }
0x10a0   :  { %2021 = vrcp.f32 %v1296_v17 }
0x10ad   :  { %v2022_v42 = vpop.eup %2021 }
0x10ae   :  { %v1302_v19 = vmul.f32 %v2022_v42, %v1300_v43 }
0x110c   :  { %v1305_v18 = vpop.permute.xlu0 %1304 }
0x110d   :  { %v1307_v34 = vmul.f32 %v2022_v42, %v1305_v18 }
0x110f   :  { %1309 = vrot.lane.b32.xlu1 %v1307_v34, %s2044_s27 }
0x1181   :  { %v1310_v20 = vpop.permute.xlu1 %1309 }
0x1182   :  { %v1312_v21 = vadd.f32 %v1310_v20, %v1302_v19 }
0x1184   :  { %2023 = vtanh.f32 %v1312_v21  ;;  %v1406_v45 = vrot.slane %v1312_v21, 6 }
0x1191   :  { %v2024_v23 = vpop.eup %2023 }
0x1192   :  { %1315 = vrot.lane.b32.xlu0 %v2024_v23, %s2044_s27 }
0x1204   :  { %v1316_v25 = vpop.permute.xlu0 %1315 }
0x1205   :  { %v1318_v26 = vmul.f32 %v2022_v42, %v1316_v25 }
0x1207   :  { %v1320_v27 = vrot.slane %v1318_v26, 2  ;;  %v1537_v51 = vsel %vm1531_vm4, %v2612_v0, %v1318_v26  ;;  %v29_v0 = vld [vmem:[%s2675_s5 + $0x1b] sm:$0xff] }
0x1208   :  { %1962 = vmatprep.subr.mxu1 %v29_v0 }
0x1209   :  { %1321 = vrot.lane.b32.xlu1 %v1320_v27, %s2042_s2 }
0x127b   :  { %v1322_v28 = vpop.permute.xlu1 %1321 }
0x127c   :  { %1949 = vmatmul.mubr.msk.f32.vlgmr.msra.gmra.mxu1 %vm696_vm3, %v1322_v28 }
0x127d   :  { %1963 = vmatpush3.msra.mxu1 %v29_v0 }
0x127e   :  { %1964 = vmatprep.subr.mxu1 %v28_v3 }
0x127f   :  { %1965 = vmatpush3.msra.mxu1 %v28_v3 }
0x133c   :  { %v1391_v58 = vpop.f32.mrf.mxu1 }
0x133d   :  { %v1396_v29 = vrot.slane %v1391_v58, 4 }
0x133e   :  { %v1950_v30 = vpop.f32.mrf.mxu1 }
0x133f   :  { %v1398_v31 = vadd.f32 %v1396_v29, %v2532_v22 }
0x1341   :  { %2025 = vtanh.f32 %v1398_v31  ;;  %v1399_v33 = vsub.f32 0.0, %v1398_v31 }
0x1343   :  { %v1400_v35 = vmul.f32 1.442695, %v1399_v33 }
0x1345   :  { %2027 = vpow2.f32 %v1400_v35 }
0x134e   :  { %v2026_v32 = vpop.eup %2025 }
0x134f   :  { %1410 = vrot.lane.b32.xlu0 %v2026_v32, %s2044_s27 }
0x1352   :  { %v2028_v36 = vpop.eup %2027 }
0x1353   :  { %v1402_v37 = vadd.f32 1.0, %v2028_v36 }
0x1355   :  { %2029 = vrcp.f32 %v1402_v37 }
0x1362   :  { %v2030_v38 = vpop.eup %2029 }
0x1363   :  { %v1408_v46 = vmul.f32 %v2030_v38, %v1406_v45 }
0x13c1   :  { %v1411_v39 = vpop.permute.xlu0 %1410 }
0x13c2   :  { %v1413_v44 = vmul.f32 %v2030_v38, %v1411_v39 }
0x13c4   :  { %1415 = vrot.lane.b32.xlu1 %v1413_v44, %s2044_s27 }
0x1436   :  { %v1416_v47 = vpop.permute.xlu1 %1415 }
0x1437   :  { %v1418_v48 = vadd.f32 %v1416_v47, %v1408_v46 }
0x1439   :  { %2031 = vtanh.f32 %v1418_v48  ;;  %v1512_v4 = vrot.slane %v1418_v48, 6 }
0x1446   :  { %v2032_v49 = vpop.eup %2031 }
0x1447   :  { %1421 = vrot.lane.b32.xlu0 %v2032_v49, %s2044_s27 }
0x14b9   :  { %v1422_v24 = vpop.permute.xlu0 %1421 }
0x14ba   :  { %v1424_v50 = vmul.f32 %v2030_v38, %v1422_v24 }
0x14bc   :  { %v1426_v52 = vrot.slane %v1424_v50, 4  ;;  %v1538_v54 = vsel %vm1533_vm5, %v1537_v51, %v1424_v50 }
0x14be   :  { %1427 = vrot.lane.b32.xlu1 %v1426_v52, %s2042_s2 }
0x1530   :  { %v1428_v55 = vpop.permute.xlu1 %1427 }
0x1531   :  { %1960 = vmatmul.mubr.msk.f32.vlgmr.msra.gmra.mxu0 %vm696_vm3, %v1428_v55 }
0x15f1   :  { %v1497_v56 = vpop.f32.mrf.mxu0 }
0x15f2   :  { %v1502_v57 = vrot.slane %v1497_v56, 2 }
0x15f3   :  { %v1961_v59 = vpop.f32.mrf.mxu0 }
0x15f4   :  { %v1504_v61 = vadd.f32 %v1502_v57, %v2532_v22 }
0x15f6   :  { %2033 = vtanh.f32 %v1504_v61  ;;  %v1505_v1 = vsub.f32 0.0, %v1504_v61 }
0x15f8   :  { %v1506_v2 = vmul.f32 1.442695, %v1505_v1 }
0x15fa   :  { %2035 = vpow2.f32 %v1506_v2 }
0x1603   :  { %v2034_v63 = vpop.eup %2033 }
0x1604   :  { %1516 = vrot.lane.b32.xlu0 %v2034_v63, %s2044_s27 }
0x1607   :  { %v2036_v5 = vpop.eup %2035 }
0x1608   :  { %v1508_v7 = vadd.f32 1.0, %v2036_v5 }
0x160a   :  { %2037 = vrcp.f32 %v1508_v7 }
0x1617   :  { %v2038_v8 = vpop.eup %2037 }
0x1618   :  { %v1514_v22 = vmul.f32 %v2038_v8, %v1512_v4 }
0x1676   :  { %v1517_v9 = vpop.permute.xlu0 %1516 }
0x1677   :  { %v1519_v62 = vmul.f32 %v2038_v8, %v1517_v9 }
0x1679   :  { %1521 = vrot.lane.b32.xlu1 %v1519_v62, %s2044_s27 }
0x167d   :  { %1546 = vrot.lane.b32.xlu1 %v2595_v53, %s2042_s2  ;;  %v27_v53 = vld [vmem:[%s2675_s5 + $0xb] sm:$0xff] }
0x167e   :  { %1966 = vmatprep.subr.mxu1 %v27_v53 }
0x167f   :  { %1967 = vmatpush3.msra.mxu1 %v27_v53 }
0x1680   :  { %1968 = vmatprep.subr.mxu1 %v26_v11 }
0x1681   :  { %1969 = vmatpush3.msra.mxu1 %v26_v11 }
0x16eb   :  { %v1522_v6 = vpop.permute.xlu1 %1521 }
0x16ec   :  { %v1524_v10 = vadd.f32 %v1522_v6, %v1514_v22 }
0x16ee   :  { %2039 = vtanh.f32 %v1524_v10 }
0x16ef   :  { %v1547_v60 = vpop.permute.xlu1 %1546 }
0x16f0   :  { %1970 = vmatprep.mubr.msk.f32.mxu1 %vm696_vm3, %v1547_v60 }
0x16fb   :  { %v2040_v12 = vpop.eup %2039 }
0x16fc   :  { %1527 = vrot.lane.b32.xlu0 %v2040_v12, %s2044_s27 }
0x176e   :  { %v1528_v13 = vpop.permute.xlu0 %1527 }
0x176f   :  { %v1530_v40 = vmul.f32 %v2038_v8, %v1528_v13 }
0x1771   :  { %v1539_v14 = vsel %vm1535_vm6, %v1538_v54, %v1530_v40 }
0x1772   :  { %1548 = vrot.lane.b32.xlu0 %v1539_v14, %s2042_s2 }
0x17e4   :  { %v1549_v15 = vpop.permute.xlu0 %1548 }
0x17e5   :  { %1971 = vmatmul.mubr.msk.f32.vlgmr.msra.gmra.mxu1 %vm696_vm3, %v1549_v15 }
0x18a5   :  { %v1972_v41 = vpop.f32.mrf.mxu1 }
0x18a6   :  { %v1626_v17 = vadd.f32 %v1972_v41, %v1684_v16 }
0x18a7   :  { %v1620_v42 = vpop.f32.mrf.mxu1 }
0x18a8   :  { %1631 = vst.msk [vmem:[%s2678_s6 + $0x8] sm:$0xff] %vm1629_vm7, %v1626_v17  ;;  %v1621_v18 = vadd.f32 %v1684_v16, %v1620_v42 }
0x18aa   :  { %1630 = vst.msk [vmem:[%s2678_s6] sm:$0xff] %vm1629_vm7, %v1621_v18 }

</bundles_post_ra>
